<compile_context>
chip_gen: v6e
topology: v6e:2x2x1
jax: 0.10.0
libtpu: 0.0.40
codegen_flags: <defaults>
</compile_context>

<pallas_src>
import jax
import jax.numpy as jnp
from jax.experimental import pallas as pl
from jax.experimental.pallas import tpu as pltpu


LATENT_DIMS = 32
H1 = 512
D_IN = 2048  # flattened input size == decoder output size


# ---------------------------------------------------------------------------
# Encoder kernel (K-tiled layer 1 + head): grid over the 2048 input features.
# ---------------------------------------------------------------------------
def encoder_kernel(x_ref, we1_ref, be1_ref, wmu_ref, bmu_ref,
                   wsig_ref, bsig_ref, eps_ref, z_ref, kl_ref, h_acc):
    k = pl.program_id(0)

    @pl.when(k == 0)
    def _():
        h_acc[...] = jnp.zeros_like(h_acc)

    # Partial layer-1: (1, TK) @ (TK, 512), bf16 inputs, f32 accumulate.
    h_acc[...] += jnp.dot(x_ref[...].astype(jnp.bfloat16), we1_ref[...],
                          preferred_element_type=jnp.float32)

    @pl.when(k == pl.num_programs(0) - 1)
    def _():
        h = jnp.maximum(h_acc[...] + be1_ref[...], 0.0)          # f32 ReLU
        hb = h.astype(jnp.bfloat16)
        mu = jnp.dot(hb, wmu_ref[...], preferred_element_type=jnp.float32)
        mu = mu + bmu_ref[...]
        log_sigma = jnp.dot(hb, wsig_ref[...], preferred_element_type=jnp.float32)
        log_sigma = log_sigma + bsig_ref[...]
        sigma = jnp.exp(log_sigma)
        z_ref[...] = mu + sigma * eps_ref[...]
        # kl = sum(sigma^2 + mu^2 - log(sigma) - 1/2); log(sigma) == log_sigma
        kl_ref[...] = jnp.sum(sigma * sigma + mu * mu - log_sigma - 0.5,
                              axis=(0, 1), keepdims=True)


def encoder_forward(x_flat, enc_params, eps, *, tk=512):
    we1, be1, wmu, bmu, wsig, bsig = enc_params
    K = x_flat.shape[1]
    L = wmu.shape[1]
    z, kl = pl.pallas_call(
        encoder_kernel,
        out_shape=(jax.ShapeDtypeStruct((1, L), jnp.float32),
                   jax.ShapeDtypeStruct((1, 1), jnp.float32)),
        grid_spec=pltpu.PrefetchScalarGridSpec(
            num_scalar_prefetch=0,
            grid=(K // tk,),
            in_specs=[
                pl.BlockSpec((1, tk), lambda k: (0, k)),    # x column tile
                pl.BlockSpec((tk, H1), lambda k: (k, 0)),   # We1 row tile (bf16)
                pl.BlockSpec((1, H1), lambda k: (0, 0)),    # be1
                pl.BlockSpec((H1, L), lambda k: (0, 0)),    # Wmu (bf16)
                pl.BlockSpec((1, L), lambda k: (0, 0)),     # bmu
                pl.BlockSpec((H1, L), lambda k: (0, 0)),    # Wsig (bf16)
                pl.BlockSpec((1, L), lambda k: (0, 0)),     # bsig
                pl.BlockSpec((1, L), lambda k: (0, 0)),     # eps
            ],
            out_specs=[pl.BlockSpec((1, L), lambda k: (0, 0)),
                       pl.BlockSpec((1, 1), lambda k: (0, 0))],
            scratch_shapes=[pltpu.VMEM((1, H1), jnp.float32)],
        ),
        compiler_params=pltpu.CompilerParams(
            dimension_semantics=("arbitrary",)),
    )(x_flat, we1, be1, wmu, bmu, wsig, bsig, eps)
    return z, kl[0, 0]


# ---------------------------------------------------------------------------
# Decoder kernel: grid over the N=2048 output columns of W2.
# ---------------------------------------------------------------------------
def decoder_kernel(z_ref, w1_ref, b1_ref, w2_ref, b2_ref, o_ref):
    # Tiny layer 1 recomputed per output tile: (1, L) @ (L, 512).
    h = jnp.dot(z_ref[...].astype(jnp.bfloat16), w1_ref[...],
                preferred_element_type=jnp.float32)
    h = jnp.maximum(h + b1_ref[...], 0.0)
    # Layer 2 column tile: (1, 512) @ (512, TN) + bias -> sigmoid.
    y = jnp.dot(h.astype(jnp.bfloat16), w2_ref[...],
                preferred_element_type=jnp.float32)
    y = y + b2_ref[...]
    o_ref[...] = jax.nn.sigmoid(y).astype(o_ref.dtype)


def decoder_forward(z2d, dec_params, *, tn=512):
    w1, b1, w2, b2 = dec_params
    B, L = z2d.shape
    N = w2.shape[1]
    out2d = pl.pallas_call(
        decoder_kernel,
        out_shape=jax.ShapeDtypeStruct((B, N), jnp.float32),
        grid_spec=pltpu.PrefetchScalarGridSpec(
            num_scalar_prefetch=0,
            grid=(N // tn,),
            in_specs=[
                pl.BlockSpec((B, L), lambda j: (0, 0)),     # z
                pl.BlockSpec((L, H1), lambda j: (0, 0)),    # W1 (bf16, tiny)
                pl.BlockSpec((1, H1), lambda j: (0, 0)),    # b1
                pl.BlockSpec((H1, tn), lambda j: (0, j)),   # W2 column tile (bf16)
                pl.BlockSpec((1, tn), lambda j: (0, j)),    # b2 tile
            ],
            out_specs=pl.BlockSpec((B, tn), lambda j: (0, j)),
        ),
        compiler_params=pltpu.CompilerParams(
            dimension_semantics=("parallel",)),
    )(z2d, w1, b1, w2, b2)
    # Glue reshape (matches torch `.reshape((-1, 1, 2048))`)
    return out2d.reshape((-1, 1, N))


def vae_forward(x, enc_params, dec_params, eps):
    # torch.flatten(x): flattens the entire tensor (must hold 2048 elements).
    x_flat = x.reshape((1, -1)).astype(jnp.float32)
    z2d, kl = encoder_forward(x_flat, enc_params, eps)
    out = decoder_forward(z2d, dec_params)
    return out, z2d, kl


def init_vae_params(key, latent_dims):
    """nn.Linear default init U(-1/sqrt(fan_in), 1/sqrt(fan_in)).
    Weights stored as (in, out) in bf16; biases kept in f32."""
    ks = jax.random.split(key, 10)

    def linear(kw, kb, fan_in, fan_out):
        bound = 1.0 / jnp.sqrt(jnp.float32(fan_in))
        w = jax.random.uniform(kw, (fan_in, fan_out), jnp.float32, -bound, bound)
        b = jax.random.uniform(kb, (1, fan_out), jnp.float32, -bound, bound)
        return w.astype(jnp.bfloat16), b

    we1, be1 = linear(ks[0], ks[1], D_IN, H1)
    wmu, bmu = linear(ks[2], ks[3], H1, latent_dims)
    wsig, bsig = linear(ks[4], ks[5], H1, latent_dims)
    w1, b1 = linear(ks[6], ks[7], latent_dims, H1)
    w2, b2 = linear(ks[8], ks[9], H1, D_IN)
    return (we1, be1, wmu, bmu, wsig, bsig), (w1, b1, w2, b2)


if __name__ == "__main__":
    key = jax.random.PRNGKey(0)
    kx, kp, ke = jax.random.split(key, 3)

    # The encoder's torch.flatten(x) requires exactly 2048 elements in x.
    x = jax.random.normal(kx, (1, 1, D_IN), jnp.float32)
    eps = jax.random.normal(ke, (1, LATENT_DIMS), jnp.float32)

    enc_params, dec_params = init_vae_params(kp, LATENT_DIMS)

    out, z, kl = vae_forward(x, enc_params, dec_params, eps)
    jax.block_until_ready(out)

    # ---- pure-JAX f32 reference using the same (bf16-quantized) weights ----
    we1, be1, wmu, bmu, wsig, bsig = [p.astype(jnp.float32) for p in enc_params]
    w1, b1, w2, b2 = [p.astype(jnp.float32) for p in dec_params]
    xf = x.reshape((1, -1))
    h = jnp.maximum(xf @ we1 + be1, 0.0)
    mu = h @ wmu + bmu
    log_sigma = h @ wsig + bsig
    sigma = jnp.exp(log_sigma)
    z_ref = mu + sigma * eps
    kl_ref = jnp.sum(sigma ** 2 + mu ** 2 - log_sigma - 0.5)
    out_ref = jax.nn.sigmoid(
        jnp.maximum(z_ref @ w1 + b1, 0.0) @ w2 + b2).reshape((-1, 1, D_IN))

    assert out.shape == (1, 1, D_IN), out.shape
    assert jnp.allclose(z, z_ref, atol=2e-2, rtol=2e-2), float(jnp.max(jnp.abs(z - z_ref)))
    assert jnp.allclose(kl, kl_ref, atol=5e-1, rtol=5e-2), (float(kl), float(kl_ref))
    assert jnp.allclose(out, out_ref, atol=2e-2, rtol=2e-2), float(jnp.max(jnp.abs(out - out_ref)))

    print("KERNEL_OK")
</pallas_src>

<mosaic_0001>
module attributes {stable_mosaic.version = 11 : i64} {
  func.func @encoder_kernel(%arg0: i32, %arg1: memref<1x512xf32, #tpu.memory_space<vmem>>, %arg2: memref<512x512xbf16, #tpu.memory_space<vmem>>, %arg3: memref<1x512xf32, #tpu.memory_space<vmem>>, %arg4: memref<512x32xbf16, #tpu.memory_space<vmem>>, %arg5: memref<1x32xf32, #tpu.memory_space<vmem>>, %arg6: memref<512x32xbf16, #tpu.memory_space<vmem>>, %arg7: memref<1x32xf32, #tpu.memory_space<vmem>>, %arg8: memref<1x32xf32, #tpu.memory_space<vmem>>, %arg9: memref<1x32xf32, #tpu.memory_space<vmem>>, %arg10: memref<1x1xf32, #tpu.memory_space<vmem>>, %arg11: memref<1x512xf32, #tpu.memory_space<vmem>>) attributes {dimension_semantics = [#tpu.dimension_semantics<arbitrary>], iteration_bounds = array<i64: 4>, scalar_prefetch = 0 : i64, scratch_operands = 1 : i64, tpu.core_type = #tpu.core_type<tc>, window_params = [{transform_indices = @transform_0, window_bounds = array<i64: 1, 512>}, {transform_indices = @transform_1, window_bounds = array<i64: 512, 512>}, {pipeline_mode = #tpu.pipeline_mode<synchronous>, transform_indices = @transform_2, window_bounds = array<i64: 1, 512>}, {pipeline_mode = #tpu.pipeline_mode<synchronous>, transform_indices = @transform_3, window_bounds = array<i64: 512, 32>}, {pipeline_mode = #tpu.pipeline_mode<synchronous>, transform_indices = @transform_4, window_bounds = array<i64: 1, 32>}, {pipeline_mode = #tpu.pipeline_mode<synchronous>, transform_indices = @transform_5, window_bounds = array<i64: 512, 32>}, {pipeline_mode = #tpu.pipeline_mode<synchronous>, transform_indices = @transform_6, window_bounds = array<i64: 1, 32>}, {pipeline_mode = #tpu.pipeline_mode<synchronous>, transform_indices = @transform_7, window_bounds = array<i64: 1, 32>}, {pipeline_mode = #tpu.pipeline_mode<synchronous>, transform_indices = @transform_8, window_bounds = array<i64: 1, 32>}, {pipeline_mode = #tpu.pipeline_mode<synchronous>, transform_indices = @transform_9, window_bounds = array<i64: 1, 1>}]} {
    %c0_i32 = arith.constant 0 : i32
    %0 = arith.cmpi eq, %arg0, %c0_i32 : i32
    %1 = arith.extui %0 : i1 to i32
    %c0_i32_0 = arith.constant 0 : i32
    %2 = arith.cmpi ne, %1, %c0_i32_0 : i32
    scf.if %2 {
      %cst_9 = arith.constant 0.000000e+00 : f32
      %13 = vector.broadcast %cst_9 : f32 to vector<1x512xf32>
      %c0_10 = arith.constant 0 : index
      %c0_11 = arith.constant 0 : index
      %14 = vector.load %arg11[%c0_10, %c0_11] : memref<1x512xf32, #tpu.memory_space<vmem>>, vector<1x512xf32>
      tpu.vector_store %arg11[%c0_10, %c0_11], %13 {strides = array<i32>} : memref<1x512xf32, #tpu.memory_space<vmem>>, vector<1x512xf32>,
    } else {
    }
    %c0 = arith.constant 0 : index
    %c0_1 = arith.constant 0 : index
    %3 = vector.load %arg11[%c0, %c0_1] : memref<1x512xf32, #tpu.memory_space<vmem>>, vector<1x512xf32>
    %c0_2 = arith.constant 0 : index
    %c0_3 = arith.constant 0 : index
    %4 = vector.load %arg1[%c0_2, %c0_3] : memref<1x512xf32, #tpu.memory_space<vmem>>, vector<1x512xf32>
    %5 = arith.truncf %4 : vector<1x512xf32> to vector<1x512xbf16>
    %c0_4 = arith.constant 0 : index
    %c0_5 = arith.constant 0 : index
    %6 = vector.load %arg2[%c0_4, %c0_5] : memref<512x512xbf16, #tpu.memory_space<vmem>>, vector<512x512xbf16>
    %cst = arith.constant dense<0.000000e+00> : vector<1x512xf32>
    %7 = tpu.matmul %5, %6, %cst {dimension_numbers = #tpu.dot_dimension_numbers<[1], [0], [0], [1], [0, 0, 1, 1], [], []>} : vector<1x512xbf16>, vector<512x512xbf16>, vector<1x512xf32> -> vector<1x512xf32>
    %8 = arith.addf %3, %7 : vector<1x512xf32>
    %c0_6 = arith.constant 0 : index
    %c0_7 = arith.constant 0 : index
    %9 = vector.load %arg11[%c0_6, %c0_7] : memref<1x512xf32, #tpu.memory_space<vmem>>, vector<1x512xf32>
    tpu.vector_store %arg11[%c0_6, %c0_7], %8 {strides = array<i32>} : memref<1x512xf32, #tpu.memory_space<vmem>>, vector<1x512xf32>,
    %c3_i32 = arith.constant 3 : i32
    %10 = arith.cmpi eq, %arg0, %c3_i32 : i32
    %11 = arith.extui %10 : i1 to i32
    %c0_i32_8 = arith.constant 0 : i32
    %12 = arith.cmpi ne, %11, %c0_i32_8 : i32
    scf.if %12 {
      %c0_9 = arith.constant 0 : index
      %c0_10 = arith.constant 0 : index
      %13 = vector.load %arg11[%c0_9, %c0_10] : memref<1x512xf32, #tpu.memory_space<vmem>>, vector<1x512xf32>
      %c0_11 = arith.constant 0 : index
      %c0_12 = arith.constant 0 : index
      %14 = vector.load %arg3[%c0_11, %c0_12] : memref<1x512xf32, #tpu.memory_space<vmem>>, vector<1x512xf32>
      %15 = arith.addf %13, %14 : vector<1x512xf32>
      %cst_13 = arith.constant 0.000000e+00 : f32
      %16 = vector.broadcast %cst_13 : f32 to vector<1x512xf32>
      %17 = arith.maximumf %15, %16 : vector<1x512xf32>
      %18 = arith.truncf %17 : vector<1x512xf32> to vector<1x512xbf16>
      %c0_14 = arith.constant 0 : index
      %c0_15 = arith.constant 0 : index
      %19 = vector.load %arg4[%c0_14, %c0_15] : memref<512x32xbf16, #tpu.memory_space<vmem>>, vector<512x32xbf16>
      %cst_16 = arith.constant dense<0.000000e+00> : vector<1x32xf32>
      %20 = tpu.matmul %18, %19, %cst_16 {dimension_numbers = #tpu.dot_dimension_numbers<[1], [0], [0], [1], [0, 0, 1, 1], [], []>} : vector<1x512xbf16>, vector<512x32xbf16>, vector<1x32xf32> -> vector<1x32xf32>
      %c0_17 = arith.constant 0 : index
      %c0_18 = arith.constant 0 : index
      %21 = vector.load %arg5[%c0_17, %c0_18] : memref<1x32xf32, #tpu.memory_space<vmem>>, vector<1x32xf32>
      %22 = arith.addf %20, %21 : vector<1x32xf32>
      %c0_19 = arith.constant 0 : index
      %c0_20 = arith.constant 0 : index
      %23 = vector.load %arg6[%c0_19, %c0_20] : memref<512x32xbf16, #tpu.memory_space<vmem>>, vector<512x32xbf16>
      %cst_21 = arith.constant dense<0.000000e+00> : vector<1x32xf32>
      %24 = tpu.matmul %18, %23, %cst_21 {dimension_numbers = #tpu.dot_dimension_numbers<[1], [0], [0], [1], [0, 0, 1, 1], [], []>} : vector<1x512xbf16>, vector<512x32xbf16>, vector<1x32xf32> -> vector<1x32xf32>
      %c0_22 = arith.constant 0 : index
      %c0_23 = arith.constant 0 : index
      %25 = vector.load %arg7[%c0_22, %c0_23] : memref<1x32xf32, #tpu.memory_space<vmem>>, vector<1x32xf32>
      %26 = arith.addf %24, %25 : vector<1x32xf32>
      %27 = math.exp %26 : vector<1x32xf32>
      %c0_24 = arith.constant 0 : index
      %c0_25 = arith.constant 0 : index
      %28 = vector.load %arg8[%c0_24, %c0_25] : memref<1x32xf32, #tpu.memory_space<vmem>>, vector<1x32xf32>
      %29 = arith.mulf %27, %28 : vector<1x32xf32>
      %30 = arith.addf %22, %29 : vector<1x32xf32>
      %c0_26 = arith.constant 0 : index
      %c0_27 = arith.constant 0 : index
      %31 = vector.load %arg9[%c0_26, %c0_27] : memref<1x32xf32, #tpu.memory_space<vmem>>, vector<1x32xf32>
      tpu.vector_store %arg9[%c0_26, %c0_27], %30 {strides = array<i32>} : memref<1x32xf32, #tpu.memory_space<vmem>>, vector<1x32xf32>,
      %32 = arith.mulf %27, %27 : vector<1x32xf32>
      %33 = arith.mulf %22, %22 : vector<1x32xf32>
      %34 = arith.addf %32, %33 : vector<1x32xf32>
      %35 = arith.subf %34, %26 : vector<1x32xf32>
      %cst_28 = arith.constant 5.000000e-01 : f32
      %36 = vector.broadcast %cst_28 : f32 to vector<1x32xf32>
      %37 = arith.subf %35, %36 : vector<1x32xf32>
      %38 = vector.shape_cast %37 : vector<1x32xf32> to vector<1x1x32xf32>
      %cst_29 = arith.constant dense<0.000000e+00> : vector<1xf32>
      %39 = vector.multi_reduction <add>, %38, %cst_29 [1, 2] : vector<1x1x32xf32> to vector<1xf32>
      %40 = vector.shape_cast %39 : vector<1xf32> to vector<1x1x1xf32>
      %41 = vector.extract %40[0, 0, 0] : f32 from vector<1x1x1xf32>
      %42 = vector.broadcast %41 : f32 to vector<1x1xf32>
      %c0_30 = arith.constant 0 : index
      %c0_31 = arith.constant 0 : index
      %43 = vector.load %arg10[%c0_30, %c0_31] : memref<1x1xf32, #tpu.memory_space<vmem>>, vector<1x1xf32>
      tpu.vector_store %arg10[%c0_30, %c0_31], %42 {strides = array<i32>} : memref<1x1xf32, #tpu.memory_space<vmem>>, vector<1x1xf32>,
    } else {
    }
    return
  }
  func.func @transform_0(%arg0: i32) -> (i32, i32) {
    %c0_i32 = arith.constant 0 : i32
    %c0_i32_0 = arith.constant 0 : i32
    return %c0_i32, %arg0 : i32, i32
  }
  func.func @transform_1(%arg0: i32) -> (i32, i32) {
    %c0_i32 = arith.constant 0 : i32
    %c0_i32_0 = arith.constant 0 : i32
    return %arg0, %c0_i32 : i32, i32
  }
  func.func @transform_2(%arg0: i32) -> (i32, i32) {
    %c0_i32 = arith.constant 0 : i32
    %c0_i32_0 = arith.constant 0 : i32
    %c0_i32_1 = arith.constant 0 : i32
    return %c0_i32, %c0_i32_0 : i32, i32
  }
  func.func @transform_3(%arg0: i32) -> (i32, i32) {
    %c0_i32 = arith.constant 0 : i32
    %c0_i32_0 = arith.constant 0 : i32
    %c0_i32_1 = arith.constant 0 : i32
    return %c0_i32, %c0_i32_0 : i32, i32
  }
  func.func @transform_4(%arg0: i32) -> (i32, i32) {
    %c0_i32 = arith.constant 0 : i32
    %c0_i32_0 = arith.constant 0 : i32
    %c0_i32_1 = arith.constant 0 : i32
    return %c0_i32, %c0_i32_0 : i32, i32
  }
  func.func @transform_5(%arg0: i32) -> (i32, i32) {
    %c0_i32 = arith.constant 0 : i32
    %c0_i32_0 = arith.constant 0 : i32
    %c0_i32_1 = arith.constant 0 : i32
    return %c0_i32, %c0_i32_0 : i32, i32
  }
  func.func @transform_6(%arg0: i32) -> (i32, i32) {
    %c0_i32 = arith.constant 0 : i32
    %c0_i32_0 = arith.constant 0 : i32
    %c0_i32_1 = arith.constant 0 : i32
    return %c0_i32, %c0_i32_0 : i32, i32
  }
  func.func @transform_7(%arg0: i32) -> (i32, i32) {
    %c0_i32 = arith.constant 0 : i32
    %c0_i32_0 = arith.constant 0 : i32
    %c0_i32_1 = arith.constant 0 : i32
    return %c0_i32, %c0_i32_0 : i32, i32
  }
  func.func @transform_8(%arg0: i32) -> (i32, i32) {
    %c0_i32 = arith.constant 0 : i32
    %c0_i32_0 = arith.constant 0 : i32
    %c0_i32_1 = arith.constant 0 : i32
    return %c0_i32, %c0_i32_0 : i32, i32
  }
  func.func @transform_9(%arg0: i32) -> (i32, i32) {
    %c0_i32 = arith.constant 0 : i32
    %c0_i32_0 = arith.constant 0 : i32
    %c0_i32_1 = arith.constant 0 : i32
    return %c0_i32, %c0_i32_0 : i32, i32
  }
}

</mosaic_0001>

<bundles_post_ra>
// kernel: tpu_custom_call.1
= control target key start
LH: loop header
LB: loop body
LE: loop exit
PB: predicated region body
PF: predicated region fallthrough
CT: control target
= control target key end

     0   :  { %s3915_s0 = inlined_call_operand.hbm [shape: f32[1,2048], index: 0, kind: input, shape index: {}]   ;;  %s3916_s1 = inlined_call_operand.hbm [shape: bf16[2048,512], index: 1, kind: input, shape index: {}]   ;;  %s3917_s2 = inlined_call_operand.hbm [shape: f32[1,512], index: 2, kind: input, shape index: {}]   ;;  %s3918_s3 = inlined_call_operand.vmem [shape: bf16[512,32], index: 3, kind: input, shape index: {}]   ;;  %s3919_s4 = inlined_call_operand.hbm [shape: f32[1,32], index: 4, kind: input, shape index: {}]   ;;  %s3920_s5 = inlined_call_operand.vmem [shape: bf16[512,32], index: 5, kind: input, shape index: {}]   ;;  %s3921_s6 = inlined_call_operand.hbm [shape: f32[1,32], index: 6, kind: input, shape index: {}]   ;;  %s3922_s7 = inlined_call_operand.hbm [shape: f32[1,32], index: 7, kind: input, shape index: {}]   ;;  %s3923_s8 = inlined_call_operand.hbm [shape: f32[1,32], index: 8, kind: output, shape index: {0}]   ;;  %s3924_s9 = inlined_call_operand.hbm [shape: f32[1,1], index: 9, kind: output, shape index: {1}]  }
   0x1   :  { %3928 = sst [smem:[#allocation24_spill]] %s3917_s2 }
   0x2   :  { %15 = vsyncpa [#allocation4], 0 }
   0x3   :  { %17 = vsyncpa [#allocation4 + $0x1], 0 }
   0x4   :  { %18 = vsyncpa [#allocation7], 0 }
   0x5   :  { %20 = vsyncpa [#allocation7 + $0x1], 0 }
   0x6   :  { %21 = vsyncpa [#allocation10], 0 }
   0x7   :  { %22 = vsyncpa [#allocation13], 0 }
   0x8   :  { %23 = vsyncpa [#allocation5], 0 }
   0x9   :  { %24 = vsyncpa [#allocation16], 0  ;;  %s3311_s30 = smov 0   ;;  %s3313_s10 = smov 0  }
   0xa   :  { %s3315_s11 = smov 0   ;;  %s3317_s12 = smov 0  }
   0xb LB: > { %s3249_s13 = smov [#allocation8]   ;;  %s3332_s15 = sadd.s32 4294967295, %s3247_s12   ;;  %s3247_s12 = sphi %s3317_s12, %s3947_s12   ;;  %s3243_s11 = sphi %s3315_s11, %s3946_s11   ;;  %s3239_s10 = sphi %s3313_s10, %s3945_s10   ;;  %s3235_s30 = sphi %s3311_s30, %s3944_s30  }
   0xc   : > { %s268_s14 = sshll.u32 %s3249_s13, 4  ;;  %p2306_p0 = scmp.ge.s32.totalorder %s3247_s12, 1  ;;  %s269_s14 = int_to_ptr.vmem [resolvable:$true] %s268_s14 }
   0xd   : > { %p3925_p1 = scmp.eq.s32.totalorder %s3332_s15, 0  ;;  %p255_p2 = scmp.lt.s32.totalorder %s3247_s12, 5 }
   0xe   : > { %s3250_s17 = smov [#allocation9]   ;;  %s3251_s19 = smov [#allocation11]  }
   0xf   : > { %p3338_p4 = pnand %p2306_p0, %p255_p2  ;;  %s282_s18 = sshll.u32 %s3250_s17, 4  ;;  %s283_s18 = int_to_ptr.vmem [resolvable:$true] %s282_s18 }
  0x10   : > { %s296_s20 = sshll.u32 %s3251_s19, 4  ;;  %s3252_s22 = smov [#allocation12]   ;;  %s3350_s20 = int_to_ptr.vmem [resolvable:$true] %s296_s20 }
  0x11   : > { %s3929_s16 = scalar_select %p3338_p4, 1, 0 }
  0x12   : > { %p2648_p5 = pneg %p3338_p4  ;;  %s3352_s23 = sshll.u32 %s3252_s22, 4  ;;  %s308_s23 = int_to_ptr.vmem [resolvable:$true] %s3352_s23 }
  0x13   : > { %s2992_s24 = scalar_lea.vmem %s269_s14, 64  ;;  %p3000_p11 = scmp.lt.s32.totalorder %s269_s14, %s269_s14 }
  0x14   : > { %p3346_p6 = pnand %p2648_p5, %p3925_p1  ;;  %p2993_p8 = scmp.ne.s32.totalorder %s269_s14, %s2992_s24 }
  0x15   : > { %p3001_p12 = scmp.lt.s32.totalorder %s2992_s24, %s2992_s24 }
  0x16   : > { %p2983_p7 = pneg %p3346_p6 }
  0x17   : > { %p3002_p13 = por %p3001_p12, %p3000_p11 }
  0x18   : > { %p2995_p9 = pnand %p2993_p8, %p2983_p7 }
  0x1a   : > { %p2996_p10 = pneg %p2995_p9 }
  0x1c   : > { %p3003_p0 = pnand %p3002_p13, %p2996_p10 }
  0x1e   : > { %3006 = shalt.err (!%p3003_p0)
}
  0x1f   : > { %s3931_s2 = sld [smem:[#allocation24_spill]]  ;;  %s3018_s27 = scalar_lea.vmem %s283_s18, 16 }
  0x20   : > { %p3019_p2 = scmp.ne.s32.totalorder %s283_s18, %s3018_s27  ;;  %s3025_s28 = scalar_lea.vmem %s283_s18, 32 }
  0x21   : > { %p3026_p8 = scmp.lt.s32.totalorder %s283_s18, %s283_s18  ;;  %p3027_p9 = scmp.lt.s32.totalorder %s3025_s28, %s3018_s27 }
  0x22   : > { %p3021_p5 = pnand %p3019_p2, %p2983_p7 }
  0x23   : > { %p3028_p1 = por %p3027_p9, %p3026_p8 }
  0x24   : > { %p3022_p3 = pneg %p3021_p5 }
  0x25   : > { %2651 = dma.hbm_to_vmem [thread:$0]  (!%p3346_p6), %s3931_s2, 64, %s269_s14, [#allocation7]  }
  0x26   : > { %p3029_p11 = pnand %p3028_p1, %p3022_p3 }
  0x28   : > { %3032 = shalt.err (!%p3029_p11)
}
  0x29   : > { %2654 = dma.hbm_to_vmem [thread:$0]  (!%p3346_p6), %s3919_s4, 16, %s283_s18, [#allocation10]  }
  0x2a   : > { %s3044_s14 = scalar_lea.vmem %s3350_s20, 16  ;;  %s3051_s17 = scalar_lea.vmem %s3350_s20, 32 }
  0x2b   : > { %p3045_p10 = scmp.ne.s32.totalorder %s3350_s20, %s3044_s14  ;;  %p3052_p1 = scmp.lt.s32.totalorder %s3350_s20, %s3350_s20 }
  0x2c   : > { %p3053_p3 = scmp.lt.s32.totalorder %s3051_s17, %s3044_s14 }
  0x2d   : > { %p3047_p12 = pnand %p3045_p10, %p2983_p7 }
  0x2e   : > { %p3054_p0 = por %p3053_p3, %p3052_p1 }
  0x2f   : > { %p3048_p13 = pneg %p3047_p12 }
  0x31   : > { %p3055_p2 = pnand %p3054_p0, %p3048_p13 }
  0x33   : > { %3058 = shalt.err (!%p3055_p2)
}
  0x34   : > { %2657 = dma.hbm_to_vmem [thread:$0]  (!%p3346_p6), %s3921_s6, 16, %s3350_s20, [#allocation10]  }
  0x35   : > { %s3070_s18 = scalar_lea.vmem %s308_s23, 16  ;;  %s3077_s24 = scalar_lea.vmem %s308_s23, 32 }
  0x36   : > { %p3071_p5 = scmp.ne.s32.totalorder %s308_s23, %s3070_s18  ;;  %p3078_p11 = scmp.lt.s32.totalorder %s308_s23, %s308_s23 }
  0x37   : > { %p3079_p10 = scmp.lt.s32.totalorder %s3077_s24, %s3070_s18 }
  0x38   : > { %p3073_p8 = pnand %p3071_p5, %p2983_p7 }
  0x39   : > { %p3080_p12 = por %p3079_p10, %p3078_p11 }
  0x3a   : > { %p3074_p9 = pneg %p3073_p8 }
  0x3c   : > { %p3081_p13 = pnand %p3080_p12, %p3074_p9 }
  0x3e   : > { %3084 = shalt.err (!%p3081_p13)
}
  0x3f   : > { %2660 = dma.hbm_to_vmem [thread:$0]  (!%p3346_p6), %s3922_s7, 16, %s308_s23, [#allocation13]  }
  0x40   : > { %s3396_s20 = sadd.s32 1, %s3247_s12   ;;  %s37_s21 = sadd.s32 1, %s3243_s11 }
  0x41   : > { %s34_s27 = ssub.s32 %s3247_s12, %s3396_s20  ;;  %p44_p7 = scmp.ne.s32.totalorder %s3243_s11, %s3239_s10 }
  0x42   : > { %p35_p1 = scmp.eq.s32.totalorder %s34_s27, 0  ;;  %p45_p3 = scmp.eq.s32.totalorder %s3247_s12, 0 }
  0x43   : > { %p50_p0 = scmp.ne.s32.totalorder %s3239_s10, %s3235_s30  ;;  %p2672_p2 = scmp.lt.s32.totalorder %s3247_s12, 4 }
  0x44   : > { %s3408_s28 = scalar_select %p35_p1, %s3243_s11, %s37_s21  }
  0x45   : > { %p46_p5 = por %p45_p3, %p44_p7  ;;  %p3932_p8 = scmp.eq.s32.totalorder %s3332_s15, 0 }
  0x46   : > { %s3417_s13 = sand.u32 1, %s3243_s11   ;;  %s2527_s23 = sshll.u32 %s3247_s12, 6 }
  0x47   : > { %p3412_p9 = por %p3932_p8, %p50_p0  ;;  %s2312_s14 = sshll.u32 %s3417_s13, 2 }
  0x48   : > { %s3424_s30 = scalar_lea.hbm %s3915_s0, %s2527_s23  ;;  %s322_s22 = scalar_lea.vmem [#allocation3], %s2312_s14 }
  0x49   : > { %s3933_s29 = scalar_select %p3412_p9, 1, 0 }
  0x4a   : > { %s330_s18 = sshll.u32 %s322_s22, 4  ;;  %p3426_p6 = pnand %p2672_p2, %p46_p5  ;;  %s331_s18 = int_to_ptr.vmem [resolvable:$true] %s330_s18 }
  0x4b   : > { %s2315_s25 = sshll.u32 %s3417_s13, 10  ;;  %s319_s26 = scalar_lea.sflag [#allocation4], %s3417_s13 }
  0x4c   : > { %s3085_s21 = scalar_lea.hbm %s3424_s30, 64  ;;  %p3087_p10 = pneg %p3426_p6 }
  0x4d   : > { %p3086_p11 = scmp.ne.s32.totalorder %s3424_s30, %s3085_s21  ;;  %s3090_s14 = scalar_lea.hbm %s3915_s0, 256 }
  0x4e   : > { %p3091_p7 = scmp.lt.s32.totalorder %s3424_s30, %s3915_s0  ;;  %p3092_p1 = scmp.lt.s32.totalorder %s3090_s14, %s3085_s21 }
  0x4f   : > { %p3088_p12 = pnand %p3087_p10, %p3086_p11 }
  0x50   : > { %p3093_p3 = por %p3092_p1, %p3091_p7 }
  0x51   : > { %p3089_p13 = pneg %p3088_p12 }
  0x53   : > { %p3094_p0 = pnand %p3093_p3, %p3089_p13 }
  0x55   : > { %3097 = shalt.err (!%p3094_p0)
}
  0x56   : > { %s3098_s13 = scalar_lea.vmem %s331_s18, 64  ;;  %s3253_s22 = smov [#allocation3]  }
  0x57   : > { %p3099_p2 = scmp.ne.s32.totalorder %s331_s18, %s3098_s13  ;;  %s3103_s2 = sshll.u32 %s3253_s22, 4  ;;  %s3104_s2 = int_to_ptr.vmem [resolvable:$false] %s3103_s2 }
  0x58   : > { %s3105_s27 = scalar_lea.vmem %s3104_s2, 128  ;;  %p3106_p11 = scmp.lt.s32.totalorder %s331_s18, %s3104_s2 }
  0x59   : > { %p3101_p5 = pnand %p3099_p2, %p3087_p10  ;;  %p3107_p12 = scmp.lt.s32.totalorder %s3105_s27, %s3098_s13 }
  0x5b   : > { %p3102_p8 = pneg %p3101_p5  ;;  %p3108_p9 = por %p3107_p12, %p3106_p11 }
  0x5d   : > { %p3109_p4 = pnand %p3108_p9, %p3102_p8 }
  0x5f   : > { %3112 = shalt.err (!%p3109_p4)
}
  0x60   : > { %2664 = dma.hbm_to_vmem [thread:$0]  (!%p3426_p6), %s3424_s30, 64, %s331_s18, %s319_s26  }
  0x61   : > { %s341_s21 = scalar_lea.vmem [#allocation6], %s2315_s25  ;;  %s337_s14 = sand.u32 1, %s3247_s12  }
  0x62   : > { %s349_s23 = sshll.u32 %s341_s21, 4  ;;  %s2529_s17 = sshll.u32 %s3247_s12, 14  ;;  %s3453_s23 = int_to_ptr.vmem [resolvable:$true] %s349_s23 }
  0x63   : > { %s3459_s2 = scalar_lea.hbm %s3916_s1, %s2529_s17  ;;  %s3461_s13 = scalar_lea.sflag [#allocation7], %s337_s14 }
  0x64   : > { %s3113_s27 = scalar_lea.hbm %s3459_s2, 16384  ;;  %s3118_s12 = scalar_lea.hbm %s3916_s1, 65536 }
  0x65   : > { %p3114_p4 = scmp.ne.s32.totalorder %s3459_s2, %s3113_s27  ;;  %p3119_p7 = scmp.lt.s32.totalorder %s3459_s2, %s3916_s1 }
  0x66   : > { %p3120_p1 = scmp.lt.s32.totalorder %s3118_s12, %s3113_s27 }
  0x67   : > { %p3116_p9 = pnand %p3114_p4, %p3087_p10 }
  0x68   : > { %p3121_p3 = por %p3120_p1, %p3119_p7 }
  0x69   : > { %p3117_p13 = pneg %p3116_p9 }
  0x6b   : > { %p3122_p0 = pnand %p3121_p3, %p3117_p13 }
  0x6d   : > { %3125 = shalt.err (!%p3122_p0)
}
  0x6e   : > { %s3126_s21 = scalar_lea.vmem %s3453_s23, 16384  ;;  %s3254_s14 = smov [#allocation6]  }
  0x6f   : > { %p3127_p2 = scmp.ne.s32.totalorder %s3453_s23, %s3126_s21  ;;  %s3131_s17 = sshll.u32 %s3254_s14, 4  ;;  %s3132_s17 = int_to_ptr.vmem [resolvable:$false] %s3131_s17 }
  0x70   : > { %s3133_s19 = scalar_lea.vmem %s3132_s17, 32768  ;;  %p3134_p11 = scmp.lt.s32.totalorder %s3453_s23, %s3132_s17 }
  0x71   : > { %p3129_p5 = pnand %p3127_p2, %p3087_p10  ;;  %p3135_p12 = scmp.lt.s32.totalorder %s3133_s19, %s3126_s21 }
  0x73   : > { %p3130_p8 = pneg %p3129_p5  ;;  %p3136_p4 = por %p3135_p12, %p3134_p11 }
  0x75   : > { %p3137_p9 = pnand %p3136_p4, %p3130_p8 }
  0x77   : > { %3140 = shalt.err (!%p3137_p9)
}
  0x78   : > { %s3255_s22 = smov 256   ;;  %s3256_s27 = smov 16  }
  0x79   : > { %2667 = dma.hbm_to_vmem [thread:$0]  (!%p3426_p6), %s3459_s2, 16384, %s3453_s23, %s3461_s13, %s3255_s22, %s3255_s22, %s3256_s27  }
  0x7a   : > { %p3935_p10 = scmp.ne.s32.totalorder %s3929_s16, 0 }
  0x7b   : > { %s363_s30 = sand.u32 (!%p3935_p10), 1, %s3239_s10   ;;  %p3936_p13 = scmp.ne.s32.totalorder (!%p3935_p10), %s3933_s29, 0 }
  0x7c   : > { %361 = sbr.rel (%p3935_p10) target bundleno = 1013 (0x3f5), region = 52  ;;  %s2320_s18 = sshll.u32 (!%p3935_p10), %s363_s30, 2 }
  0x7d   : > { %s364_s12 = scalar_lea.sflag (!%p3935_p10), [#allocation4], %s363_s30  ;;  %s3489_s25 = scalar_lea.vmem (!%p3935_p10), [#allocation3], %s2320_s18 }
  0x81   : > { %3206 = dma.done.wait (%p3936_p13), %s364_s12, 64  }
  0x82   : > { %3208 = vsyncadd (%p3936_p13), %s364_s12, 4294967232  ;;  %s372_s26 = sand.u32 1, %s3332_s15   ;;  %s2321_s24 = sshll.u32 %s363_s30, 10 }
  0x83   : > { %s373_s23 = scalar_lea.sflag [#allocation7], %s372_s26  ;;  %s3496_s2 = scalar_lea.vmem [#allocation6], %s2321_s24 }
  0x84   : > { %3210 = dma.done.wait (%p3936_p13), %s373_s23, 16384  }
  0x85   : > { %3212 = vsyncadd (%p3936_p13), %s373_s23, 4294950912  ;;  %p3937_p6 = scmp.eq.s32.totalorder %s3332_s15, 0 }
  0x87   : > { %3214 = dma.done.wait (%p3937_p6), [#allocation7], 64   ;;  %p3938_p7 = pmov %p3937_p6 }
  0x88   : > { %p3939_p1 = pmov %p3937_p6 }
  0x89   : > { %3216 = vsyncadd (%p3938_p7), [#allocation7], 4294967232 }
  0x8a   : > { %3218 = dma.done.wait (%p3939_p1), [#allocation10], 32   ;;  %p3940_p3 = pmov %p3939_p1 }
  0x8b   : > { %p3941_p0 = pmov %p3939_p1 }
  0x8c   : > { %3220 = vsyncadd (%p3940_p3), [#allocation10], 4294967264 }
  0x8d   : > { %3222 = dma.done.wait (%p3941_p0), [#allocation13], 16   ;;  %p3942_p2 = pmov %p3941_p0 }
  0x8e   : > { %p3943_p5 = scmp.ne.s32.totalorder %s3332_s15, 0 }
  0x8f   : > { %3224 = vsyncadd (%p3942_p2), [#allocation13], 4294967280 }
  0x90   : > { %433 = sbr.rel (%p3943_p5) target bundleno = 153 (0x99), region = 80 }
  0x95   : > { %v434_v0 = vlaneseq  ;;  %v3257_v1 = vmov 0.0  }
  0x97   : > { %vm436_vm0 = vcmp.lt.s32.totalorder %v434_v0, 512 }
  0x98   : > { %438 = vst.msk [vmem:[#allocation2] sm:$0xf] %vm436_vm0, %v3257_v1 }
  0x99 PF: > { %v2723_v2 = vld [vmem:[%s3496_s2 + $0xe4] ss:$16 sps:$4 sm:$0xff]   ;;  %v2727_v4 = vld [vmem:[%s3496_s2 + $0xe0] ss:$16 sps:$4 sm:$0xff]   ;;  %v442_v38 = vlaneseq  ;;  %v440_v52 = vld [vmem:[%s3489_s25] sm:$0xf] }
  0x9a   : > { %v2725_v3 = vld [vmem:[%s3496_s2 + $0x2e4] ss:$16 sps:$4 sm:$0xff]   ;;  %1234 = vmatprep.subr.bf16.mxu0 %v2723_v2  ;;  %v2728_v5 = vld [vmem:[%s3496_s2 + $0x2e0] ss:$16 sps:$4 sm:$0xff]   ;;  %p2455_p8 = scmp.ne.s32.totalorder %s3332_s15, 3 }
  0x9b   : > { %1275 = vmatprep.subr.bf16.mxu1 %v2725_v3  ;;  %v2729_v6 = vld [vmem:[%s3496_s2 + $0xc4] ss:$16 sps:$4 sm:$0xff]   ;;  %1235 = vmatpush1.bf16.msra.mxu0 %v2727_v4  ;;  %v2733_v8 = vld [vmem:[%s3496_s2 + $0xc0] ss:$16 sps:$4 sm:$0xff]   ;;  %v3556_v42 = vshrl.u32 %v442_v38, 7  ;;  %vm1430_vm1 = vcmp.lt.s32.totalorder %v442_v38, 512 }
  0x9c   : > { %1276 = vmatpush1.bf16.msra.mxu1 %v2728_v5  ;;  %v2731_v7 = vld [vmem:[%s3496_s2 + $0x2c4] ss:$16 sps:$4 sm:$0xff]   ;;  %1236 = vmatprep.subr.bf16.mxu0 %v2729_v6  ;;  %v2734_v9 = vld [vmem:[%s3496_s2 + $0x2c0] ss:$16 sps:$4 sm:$0xff]  }
  0x9d   : > { %1277 = vmatprep.subr.bf16.mxu1 %v2731_v7  ;;  %v2735_v10 = vld [vmem:[%s3496_s2 + $0xa4] ss:$16 sps:$4 sm:$0xff]   ;;  %v2739_v12 = vld [vmem:[%s3496_s2 + $0xa0] ss:$16 sps:$4 sm:$0xff]   ;;  %v448_v48 = vsub.s32 1, %v3556_v42  ;;  %v456_v49 = vsub.s32 3, %v3556_v42 }
  0x9e   : > { %v2737_v11 = vld [vmem:[%s3496_s2 + $0x2a4] ss:$16 sps:$4 sm:$0xff]   ;;  %v2740_v13 = vld [vmem:[%s3496_s2 + $0x2a0] ss:$16 sps:$4 sm:$0xff]   ;;  %v444_v6 = vsub.s32 0, %v3556_v42  ;;  %v452_v7 = vsub.s32 2, %v3556_v42 }
  0x9f   : > { %1237 = vmatpush1.bf16.msra.mxu0 %v2733_v8  ;;  %v2741_v14 = vld [vmem:[%s3496_s2 + $0x84] ss:$16 sps:$4 sm:$0xff]   ;;  %v2745_v16 = vld [vmem:[%s3496_s2 + $0x80] ss:$16 sps:$4 sm:$0xff]   ;;  %v449_v54 = vrot.slane %v440_v52, %v448_v48  ;;  %v457_v55 = vrot.slane %v440_v52, %v456_v49 }
  0xa0   : > { %1278 = vmatpush1.bf16.msra.mxu1 %v2734_v9  ;;  %1238 = vmatprep.subr.bf16.mxu0 %v2735_v10  ;;  %v2743_v15 = vld [vmem:[%s3496_s2 + $0x284] ss:$16 sps:$4 sm:$0xff]   ;;  %v2746_v17 = vld [vmem:[%s3496_s2 + $0x280] ss:$16 sps:$4 sm:$0xff]  }
  0xa1   : > { %1279 = vmatprep.subr.bf16.mxu1 %v2737_v11  ;;  %v2747_v18 = vld [vmem:[%s3496_s2 + $0x64] ss:$16 sps:$4 sm:$0xff]   ;;  %v2751_v20 = vld [vmem:[%s3496_s2 + $0x60] ss:$16 sps:$4 sm:$0xff]   ;;  %v463_v59 = vpack.c.bf16 %v449_v54, %v449_v54  ;;  %v465_v60 = vpack.c.bf16 %v457_v55, %v457_v55  ;;  %v2872_v54 = vld [vmem:[%s3496_s2 + $0x3ec] ss:$16 sps:$4 sm:$0xff]  }
  0xa2   : > { %v2749_v19 = vld [vmem:[%s3496_s2 + $0x264] ss:$16 sps:$4 sm:$0xff]   ;;  %v2752_v21 = vld [vmem:[%s3496_s2 + $0x260] ss:$16 sps:$4 sm:$0xff]   ;;  %v2867_v55 = vld [vmem:[%s3496_s2 + $0x1e8] ss:$16 sps:$4 sm:$0xff]  }
  0xa3   : > { %1239 = vmatpush1.bf16.msra.mxu0 %v2739_v12  ;;  %v2753_v22 = vld [vmem:[%s3496_s2 + $0x44] ss:$16 sps:$4 sm:$0xff]   ;;  %v2757_v24 = vld [vmem:[%s3496_s2 + $0x40] ss:$16 sps:$4 sm:$0xff]   ;;  %1266 = vmatprep.mubr.bf16.mxu0 %v463_v59  ;;  %v445_v12 = vrot.slane %v440_v52, %v444_v6 }
  0xa4   : > { %1280 = vmatpush1.bf16.msra.mxu1 %v2740_v13  ;;  %1240 = vmatprep.subr.bf16.mxu0 %v2741_v14  ;;  %v2755_v23 = vld [vmem:[%s3496_s2 + $0x244] ss:$16 sps:$4 sm:$0xff]   ;;  %v2758_v25 = vld [vmem:[%s3496_s2 + $0x240] ss:$16 sps:$4 sm:$0xff]   ;;  %v453_v13 = vrot.slane %v440_v52, %v452_v7  ;;  %v2864_v52 = vld [vmem:[%s3496_s2 + $0x208] ss:$16 sps:$4 sm:$0xff]  }
  0xa5   : > { %1281 = vmatprep.subr.bf16.mxu1 %v2743_v15  ;;  %v2759_v26 = vld [vmem:[%s3496_s2 + $0x24] ss:$16 sps:$4 sm:$0xff]   ;;  %v2763_v28 = vld [vmem:[%s3496_s2 + $0x20] ss:$16 sps:$4 sm:$0xff]   ;;  %1307 = vmatprep.mubr.bf16.mxu1 %v465_v60  ;;  %v2821_v15 = vld [vmem:[%s3496_s2 + $0xec] ss:$16 sps:$4 sm:$0xff]  }
  0xa6   : > { %v2761_v27 = vld [vmem:[%s3496_s2 + $0x224] ss:$16 sps:$4 sm:$0xff]   ;;  %v2764_v29 = vld [vmem:[%s3496_s2 + $0x220] ss:$16 sps:$4 sm:$0xff]  }
  0xa7   : > { %1241 = vmatpush1.bf16.msra.mxu0 %v2745_v16  ;;  %v2765_v30 = vld [vmem:[%s3496_s2 + $0x4] ss:$16 sps:$4 sm:$0xff]   ;;  %v2769_v32 = vld [vmem:[%s3496_s2] ss:$16 sps:$4 sm:$0xff]   ;;  %v2824_v16 = vld [vmem:[%s3496_s2 + $0x2ec] ss:$16 sps:$4 sm:$0xff]  }
  0xa8   : > { %1282 = vmatpush1.bf16.msra.mxu1 %v2746_v17  ;;  %1242 = vmatprep.subr.bf16.mxu0 %v2747_v18  ;;  %v2767_v31 = vld [vmem:[%s3496_s2 + $0x204] ss:$16 sps:$4 sm:$0xff]   ;;  %v2770_v33 = vld [vmem:[%s3496_s2 + $0x200] ss:$16 sps:$4 sm:$0xff]   ;;  %v3598_v17 = vpack.c.bf16 %v445_v12, %v445_v12  ;;  %v3600_v18 = vpack.c.bf16 %v453_v13, %v453_v13  ;;  %v2902_v12 = vld [vmem:[%s3496_s2 + $0x34c] ss:$16 sps:$4 sm:$0xff]  }
  0xa9   : > { %1283 = vmatprep.subr.bf16.mxu1 %v2749_v19  ;;  %v2771_v34 = vld [vmem:[%s3496_s2 + $0x1e4] ss:$16 sps:$4 sm:$0xff]   ;;  %v2775_v36 = vld [vmem:[%s3496_s2 + $0x1e0] ss:$16 sps:$4 sm:$0xff]   ;;  %v2819_v19 = vld [vmem:[%s3496_s2 + $0xe8] ss:$16 sps:$4 sm:$0xff]  }
  0xaa   : > { %v2773_v35 = vld [vmem:[%s3496_s2 + $0x3e4] ss:$16 sps:$4 sm:$0xff]   ;;  %v2776_v37 = vld [vmem:[%s3496_s2 + $0x3e0] ss:$16 sps:$4 sm:$0xff]   ;;  %v2897_v13 = vld [vmem:[%s3496_s2 + $0x148] ss:$16 sps:$4 sm:$0xff]  }
  0xab   : > { %1243 = vmatpush1.bf16.msra.mxu0 %v2751_v20  ;;  %v2777_v39 = vld [vmem:[%s3496_s2 + $0x1c4] ss:$16 sps:$4 sm:$0xff]   ;;  %v2781_v41 = vld [vmem:[%s3496_s2 + $0x1c0] ss:$16 sps:$4 sm:$0xff]   ;;  %v2822_v20 = vld [vmem:[%s3496_s2 + $0x2e8] ss:$16 sps:$4 sm:$0xff]  }
  0xac   : > { %1284 = vmatpush1.bf16.msra.mxu1 %v2752_v21  ;;  %1244 = vmatprep.subr.bf16.mxu0 %v2753_v22  ;;  %v2779_v40 = vld [vmem:[%s3496_s2 + $0x3c4] ss:$16 sps:$4 sm:$0xff]   ;;  %v2782_v43 = vld [vmem:[%s3496_s2 + $0x3c0] ss:$16 sps:$4 sm:$0xff]   ;;  %v2827_v21 = vld [vmem:[%s3496_s2 + $0xcc] ss:$16 sps:$4 sm:$0xff]  }
  0xad   : > { %1285 = vmatprep.subr.bf16.mxu1 %v2755_v23  ;;  %v2783_v44 = vld [vmem:[%s3496_s2 + $0x1a4] ss:$16 sps:$4 sm:$0xff]   ;;  %v2787_v46 = vld [vmem:[%s3496_s2 + $0x1a0] ss:$16 sps:$4 sm:$0xff]   ;;  %v2830_v22 = vld [vmem:[%s3496_s2 + $0x2cc] ss:$16 sps:$4 sm:$0xff]  }
  0xae   : > { %v2785_v45 = vld [vmem:[%s3496_s2 + $0x3a4] ss:$16 sps:$4 sm:$0xff]   ;;  %v2788_v47 = vld [vmem:[%s3496_s2 + $0x3a0] ss:$16 sps:$4 sm:$0xff]   ;;  %v2825_v23 = vld [vmem:[%s3496_s2 + $0xc8] ss:$16 sps:$4 sm:$0xff]  }
  0xaf   : > { %1245 = vmatpush1.bf16.msra.mxu0 %v2757_v24  ;;  %v2789_v50 = vld [vmem:[%s3496_s2 + $0x184] ss:$16 sps:$4 sm:$0xff]   ;;  %v2793_v53 = vld [vmem:[%s3496_s2 + $0x180] ss:$16 sps:$4 sm:$0xff]   ;;  %v2828_v24 = vld [vmem:[%s3496_s2 + $0x2c8] ss:$16 sps:$4 sm:$0xff]  }
  0xb0   : > { %1286 = vmatpush1.bf16.msra.mxu1 %v2758_v25  ;;  %1246 = vmatprep.subr.bf16.mxu0 %v2759_v26  ;;  %v2791_v51 = vld [vmem:[%s3496_s2 + $0x384] ss:$16 sps:$4 sm:$0xff]   ;;  %v2794_v56 = vld [vmem:[%s3496_s2 + $0x380] ss:$16 sps:$4 sm:$0xff]   ;;  %v2833_v25 = vld [vmem:[%s3496_s2 + $0xac] ss:$16 sps:$4 sm:$0xff]  }
  0xb1   : > { %1287 = vmatprep.subr.bf16.mxu1 %v2761_v27  ;;  %v2795_v57 = vld [vmem:[%s3496_s2 + $0x164] ss:$16 sps:$4 sm:$0xff]   ;;  %v2799_v61 = vld [vmem:[%s3496_s2 + $0x160] ss:$16 sps:$4 sm:$0xff]   ;;  %v2836_v26 = vld [vmem:[%s3496_s2 + $0x2ac] ss:$16 sps:$4 sm:$0xff]  }
  0xb2   : > { %v2797_v58 = vld [vmem:[%s3496_s2 + $0x364] ss:$16 sps:$4 sm:$0xff]   ;;  %v2800_v62 = vld [vmem:[%s3496_s2 + $0x360] ss:$16 sps:$4 sm:$0xff]   ;;  %v2831_v27 = vld [vmem:[%s3496_s2 + $0xa8] ss:$16 sps:$4 sm:$0xff]  }
  0xb3   : > { %1247 = vmatpush1.bf16.msra.mxu0 %v2763_v28  ;;  %v2801_v63 = vld [vmem:[%s3496_s2 + $0x144] ss:$16 sps:$4 sm:$0xff]   ;;  %v2805_v1 = vld [vmem:[%s3496_s2 + $0x140] ss:$16 sps:$4 sm:$0xff]   ;;  %v2834_v28 = vld [vmem:[%s3496_s2 + $0x2a8] ss:$16 sps:$4 sm:$0xff]  }
  0xb4   : > { %1288 = vmatpush1.bf16.msra.mxu1 %v2764_v29  ;;  %1248 = vmatprep.subr.bf16.mxu0 %v2765_v30  ;;  %v2803_v0 = vld [vmem:[%s3496_s2 + $0x344] ss:$16 sps:$4 sm:$0xff]   ;;  %v2806_v2 = vld [vmem:[%s3496_s2 + $0x340] ss:$16 sps:$4 sm:$0xff]   ;;  %v2839_v29 = vld [vmem:[%s3496_s2 + $0x8c] ss:$16 sps:$4 sm:$0xff]  }
  0xb5   : > { %1289 = vmatprep.subr.bf16.mxu1 %v2767_v31  ;;  %v2807_v3 = vld [vmem:[%s3496_s2 + $0x124] ss:$16 sps:$4 sm:$0xff]   ;;  %v2811_v5 = vld [vmem:[%s3496_s2 + $0x120] ss:$16 sps:$4 sm:$0xff]   ;;  %v2842_v30 = vld [vmem:[%s3496_s2 + $0x28c] ss:$16 sps:$4 sm:$0xff]  }
  0xb6   : > { %v2809_v4 = vld [vmem:[%s3496_s2 + $0x324] ss:$16 sps:$4 sm:$0xff]   ;;  %v2812_v8 = vld [vmem:[%s3496_s2 + $0x320] ss:$16 sps:$4 sm:$0xff]   ;;  %v2837_v31 = vld [vmem:[%s3496_s2 + $0x88] ss:$16 sps:$4 sm:$0xff]  }
  0xb7   : > { %1249 = vmatpush1.bf16.msra.mxu0 %v2769_v32  ;;  %v2813_v9 = vld [vmem:[%s3496_s2 + $0x104] ss:$16 sps:$4 sm:$0xff]   ;;  %v2817_v11 = vld [vmem:[%s3496_s2 + $0x100] ss:$16 sps:$4 sm:$0xff]   ;;  %v2840_v32 = vld [vmem:[%s3496_s2 + $0x288] ss:$16 sps:$4 sm:$0xff]  }
  0xb8   : > { %1290 = vmatpush1.bf16.msra.mxu1 %v2770_v33  ;;  %1250 = vmatprep.subr.bf16.mxu0 %v2771_v34  ;;  %v2815_v10 = vld [vmem:[%s3496_s2 + $0x304] ss:$16 sps:$4 sm:$0xff]   ;;  %v2818_v14 = vld [vmem:[%s3496_s2 + $0x300] ss:$16 sps:$4 sm:$0xff]   ;;  %v2845_v33 = vld [vmem:[%s3496_s2 + $0x6c] ss:$16 sps:$4 sm:$0xff]  }
  0xb9   : > { %1291 = vmatprep.subr.bf16.mxu1 %v2773_v35  ;;  %v2848_v34 = vld [vmem:[%s3496_s2 + $0x26c] ss:$16 sps:$4 sm:$0xff]   ;;  %v2843_v35 = vld [vmem:[%s3496_s2 + $0x68] ss:$16 sps:$4 sm:$0xff]  }
  0xbb   : > { %1251 = vmatpush2.bf16.msra.mxu0 %v2775_v36  ;;  %v2846_v36 = vld [vmem:[%s3496_s2 + $0x268] ss:$16 sps:$4 sm:$0xff]  }
  0xbc   : > { %1292 = vmatpush2.bf16.msra.mxu1 %v2776_v37  ;;  %1252 = vmatprep.subr.bf16.mxu0 %v2777_v39  ;;  %v2851_v37 = vld [vmem:[%s3496_s2 + $0x4c] ss:$16 sps:$4 sm:$0xff]  }
  0xbd   : > { %1293 = vmatprep.subr.bf16.mxu1 %v2779_v40  ;;  %v2854_v39 = vld [vmem:[%s3496_s2 + $0x24c] ss:$16 sps:$4 sm:$0xff]   ;;  %v2849_v40 = vld [vmem:[%s3496_s2 + $0x48] ss:$16 sps:$4 sm:$0xff]  }
  0xbf   : > { %1253 = vmatpush2.bf16.msra.mxu0 %v2781_v41  ;;  %v2852_v41 = vld [vmem:[%s3496_s2 + $0x248] ss:$16 sps:$4 sm:$0xff]  }
  0xc0   : > { %1294 = vmatpush2.bf16.msra.mxu1 %v2782_v43  ;;  %1254 = vmatprep.subr.bf16.mxu0 %v2783_v44  ;;  %v2857_v43 = vld [vmem:[%s3496_s2 + $0x2c] ss:$16 sps:$4 sm:$0xff]  }
  0xc1   : > { %1295 = vmatprep.subr.bf16.mxu1 %v2785_v45  ;;  %v2860_v44 = vld [vmem:[%s3496_s2 + $0x22c] ss:$16 sps:$4 sm:$0xff]   ;;  %v2855_v45 = vld [vmem:[%s3496_s2 + $0x28] ss:$16 sps:$4 sm:$0xff]  }
  0xc3   : > { %1255 = vmatpush2.bf16.msra.mxu0 %v2787_v46  ;;  %v2858_v46 = vld [vmem:[%s3496_s2 + $0x228] ss:$16 sps:$4 sm:$0xff]  }
  0xc4   : > { %1296 = vmatpush2.bf16.msra.mxu1 %v2788_v47  ;;  %1256 = vmatprep.subr.bf16.mxu0 %v2789_v50  ;;  %v2863_v47 = vld [vmem:[%s3496_s2 + $0xc] ss:$16 sps:$4 sm:$0xff]  }
  0xc5   : > { %1297 = vmatprep.subr.bf16.mxu1 %v2791_v51  ;;  %v2866_v50 = vld [vmem:[%s3496_s2 + $0x20c] ss:$16 sps:$4 sm:$0xff]   ;;  %v2861_v51 = vld [vmem:[%s3496_s2 + $0x8] ss:$16 sps:$4 sm:$0xff]  }
  0xc7   : > { %1257 = vmatpush2.bf16.msra.mxu0 %v2793_v53  ;;  %v2869_v53 = vld [vmem:[%s3496_s2 + $0x1ec] ss:$16 sps:$4 sm:$0xff]  }
  0xc8   : > { %1298 = vmatpush2.bf16.msra.mxu1 %v2794_v56  ;;  %1258 = vmatprep.subr.bf16.mxu0 %v2795_v57  ;;  %v2870_v56 = vld [vmem:[%s3496_s2 + $0x3e8] ss:$16 sps:$4 sm:$0xff]   ;;  %v2875_v57 = vld [vmem:[%s3496_s2 + $0x1cc] ss:$16 sps:$4 sm:$0xff]  }
  0xc9   : > { %1299 = vmatprep.subr.bf16.mxu1 %v2797_v58  ;;  %v2878_v58 = vld [vmem:[%s3496_s2 + $0x3cc] ss:$16 sps:$4 sm:$0xff]  }
  0xcb   : > { %1259 = vmatpush2.bf16.msra.mxu0 %v2799_v61  ;;  %v2881_v61 = vld [vmem:[%s3496_s2 + $0x1ac] ss:$16 sps:$4 sm:$0xff]  }
  0xcc   : > { %1300 = vmatpush2.bf16.msra.mxu1 %v2800_v62  ;;  %1260 = vmatprep.subr.bf16.mxu0 %v2801_v63  ;;  %v2884_v62 = vld [vmem:[%s3496_s2 + $0x3ac] ss:$16 sps:$4 sm:$0xff]   ;;  %v2879_v63 = vld [vmem:[%s3496_s2 + $0x1a8] ss:$16 sps:$4 sm:$0xff]  }
  0xcd   : > { %1301 = vmatprep.subr.bf16.mxu1 %v2803_v0  ;;  %v2882_v0 = vld [vmem:[%s3496_s2 + $0x3a8] ss:$16 sps:$4 sm:$0xff]  }
  0xcf   : > { %1261 = vmatpush2.bf16.msra.mxu0 %v2805_v1  ;;  %v2887_v1 = vld [vmem:[%s3496_s2 + $0x18c] ss:$16 sps:$4 sm:$0xff]  }
  0xd0   : > { %1302 = vmatpush2.bf16.msra.mxu1 %v2806_v2  ;;  %1262 = vmatprep.subr.bf16.mxu0 %v2807_v3  ;;  %v2890_v2 = vld [vmem:[%s3496_s2 + $0x38c] ss:$16 sps:$4 sm:$0xff]   ;;  %v2885_v3 = vld [vmem:[%s3496_s2 + $0x188] ss:$16 sps:$4 sm:$0xff]  }
  0xd1   : > { %1303 = vmatprep.subr.bf16.mxu1 %v2809_v4  ;;  %v2888_v4 = vld [vmem:[%s3496_s2 + $0x388] ss:$16 sps:$4 sm:$0xff]  }
  0xd3   : > { %1263 = vmatpush2.bf16.msra.mxu0 %v2811_v5  ;;  %v2893_v5 = vld [vmem:[%s3496_s2 + $0x16c] ss:$16 sps:$4 sm:$0xff]  }
  0xd4   : > { %1304 = vmatpush2.bf16.msra.mxu1 %v2812_v8  ;;  %1264 = vmatprep.subr.bf16.mxu0 %v2813_v9  ;;  %v2896_v8 = vld [vmem:[%s3496_s2 + $0x36c] ss:$16 sps:$4 sm:$0xff]   ;;  %v2891_v9 = vld [vmem:[%s3496_s2 + $0x168] ss:$16 sps:$4 sm:$0xff]  }
  0xd5   : > { %1305 = vmatprep.subr.bf16.mxu1 %v2815_v10  ;;  %v2894_v10 = vld [vmem:[%s3496_s2 + $0x368] ss:$16 sps:$4 sm:$0xff]  }
  0xd7   : > { %1265 = vmatpush2.bf16.msra.mxu0 %v2817_v11  ;;  %v2899_v11 = vld [vmem:[%s3496_s2 + $0x14c] ss:$16 sps:$4 sm:$0xff]  }
  0xd8   : > { %1306 = vmatpush2.bf16.msra.mxu1 %v2818_v14  ;;  %1316 = vmatprep.subr.bf16.mxu0 %v2821_v15  ;;  %v2900_v14 = vld [vmem:[%s3496_s2 + $0x348] ss:$16 sps:$4 sm:$0xff]   ;;  %v2905_v15 = vld [vmem:[%s3496_s2 + $0x12c] ss:$16 sps:$4 sm:$0xff]  }
  0xd9   : > { %1357 = vmatprep.subr.bf16.mxu1 %v2824_v16  ;;  %v2908_v16 = vld [vmem:[%s3496_s2 + $0x32c] ss:$16 sps:$4 sm:$0xff]  }
  0xda   : > { %1267 = vmatmul.mubr.bf16.vlgmr.msra.gmra.mxu0 %v3598_v17 }
  0xdb   : > { %1308 = vmatmul.mubr.bf16.vlgmr.msra.gmra.mxu1 %v3600_v18  ;;  %1317 = vmatpush1.bf16.msra.mxu0 %v2819_v19  ;;  %v2903_v19 = vld [vmem:[%s3496_s2 + $0x128] ss:$16 sps:$4 sm:$0xff]  }
  0xdc   : > { %1358 = vmatpush1.bf16.msra.mxu1 %v2822_v20  ;;  %1318 = vmatprep.subr.bf16.mxu0 %v2827_v21  ;;  %v2906_v20 = vld [vmem:[%s3496_s2 + $0x328] ss:$16 sps:$4 sm:$0xff]   ;;  %v2911_v21 = vld [vmem:[%s3496_s2 + $0x10c] ss:$16 sps:$4 sm:$0xff]  }
  0xdd   : > { %1359 = vmatprep.subr.bf16.mxu1 %v2830_v22  ;;  %1348 = vmatprep.mubr.bf16.mxu0 %v463_v59  ;;  %v2873_v59 = vld [vmem:[%s3496_s2 + $0x1c8] ss:$16 sps:$4 sm:$0xff]   ;;  %v2914_v22 = vld [vmem:[%s3496_s2 + $0x30c] ss:$16 sps:$4 sm:$0xff]  }
  0xde   : > { %1389 = vmatprep.mubr.bf16.mxu1 %v465_v60  ;;  %v2876_v60 = vld [vmem:[%s3496_s2 + $0x3c8] ss:$16 sps:$4 sm:$0xff]  }
  0xdf   : > { %1319 = vmatpush1.bf16.msra.mxu0 %v2825_v23  ;;  %v2909_v23 = vld [vmem:[%s3496_s2 + $0x108] ss:$16 sps:$4 sm:$0xff]  }
  0xe0   : > { %1360 = vmatpush1.bf16.msra.mxu1 %v2828_v24  ;;  %1320 = vmatprep.subr.bf16.mxu0 %v2833_v25  ;;  %v2912_v24 = vld [vmem:[%s3496_s2 + $0x308] ss:$16 sps:$4 sm:$0xff]  }
  0xe1   : > { %1361 = vmatprep.subr.bf16.mxu1 %v2836_v26 }
  0xe3   : > { %1321 = vmatpush1.bf16.msra.mxu0 %v2831_v27 }
  0xe4   : > { %1362 = vmatpush1.bf16.msra.mxu1 %v2834_v28  ;;  %1322 = vmatprep.subr.bf16.mxu0 %v2839_v29 }
  0xe5   : > { %1363 = vmatprep.subr.bf16.mxu1 %v2842_v30 }
  0xe7   : > { %1323 = vmatpush1.bf16.msra.mxu0 %v2837_v31 }
  0xe8   : > { %1364 = vmatpush1.bf16.msra.mxu1 %v2840_v32  ;;  %1324 = vmatprep.subr.bf16.mxu0 %v2845_v33 }
  0xe9   : > { %1365 = vmatprep.subr.bf16.mxu1 %v2848_v34 }
  0xeb   : > { %1325 = vmatpush1.bf16.msra.mxu0 %v2843_v35 }
  0xec   : > { %1366 = vmatpush1.bf16.msra.mxu1 %v2846_v36  ;;  %1326 = vmatprep.subr.bf16.mxu0 %v2851_v37  ;;  %v3258_v36 = vmov 1966171168  }
  0xed   : > { %1367 = vmatprep.subr.bf16.mxu1 %v2854_v39  ;;  %v1405_v37 = vunpack.c.l.s4 %v3258_v36 }
  0xef   : > { %1327 = vmatpush1.bf16.msra.mxu0 %v2849_v40  ;;  %v1406_v39 = vunpack.c.0.s8 %v1405_v37 }
  0xf0   : > { %1368 = vmatpush1.bf16.msra.mxu1 %v2852_v41  ;;  %1328 = vmatprep.subr.bf16.mxu0 %v2857_v43 }
  0xf1   : > { %1369 = vmatprep.subr.bf16.mxu1 %v2860_v44 }
  0xf3   : > { %1329 = vmatpush1.bf16.msra.mxu0 %v2855_v45 }
  0xf4   : > { %1370 = vmatpush1.bf16.msra.mxu1 %v2858_v46  ;;  %1330 = vmatprep.subr.bf16.mxu0 %v2863_v47 }
  0xf5   : > { %1371 = vmatprep.subr.bf16.mxu1 %v2866_v50 }
  0xf7   : > { %1331 = vmatpush1.bf16.msra.mxu0 %v2861_v51 }
  0xf8   : > { %1372 = vmatpush1.bf16.msra.mxu1 %v2864_v52  ;;  %1332 = vmatprep.subr.bf16.mxu0 %v2869_v53 }
  0xf9   : > { %1373 = vmatprep.subr.bf16.mxu1 %v2872_v54 }
  0xfb   : > { %1333 = vmatpush2.bf16.msra.mxu0 %v2867_v55 }
  0xfc   : > { %1374 = vmatpush2.bf16.msra.mxu1 %v2870_v56  ;;  %1334 = vmatprep.subr.bf16.mxu0 %v2875_v57  ;;  %v439_v56 = vld [vmem:[#allocation2] sm:$0xf] }
  0xfd   : > { %1375 = vmatprep.subr.bf16.mxu1 %v2878_v58 }
  0xff   : > { %1335 = vmatpush2.bf16.msra.mxu0 %v2873_v59 }
 0x100   : > { %1376 = vmatpush2.bf16.msra.mxu1 %v2876_v60  ;;  %1336 = vmatprep.subr.bf16.mxu0 %v2881_v61 }
 0x101   : > { %1377 = vmatprep.subr.bf16.mxu1 %v2884_v62 }
 0x103   : > { %1337 = vmatpush2.bf16.msra.mxu0 %v2879_v63 }
 0x104   : > { %1378 = vmatpush2.bf16.msra.mxu1 %v2882_v0  ;;  %1338 = vmatprep.subr.bf16.mxu0 %v2887_v1 }
 0x105   : > { %1379 = vmatprep.subr.bf16.mxu1 %v2890_v2 }
 0x107   : > { %1339 = vmatpush2.bf16.msra.mxu0 %v2885_v3 }
 0x108   : > { %1380 = vmatpush2.bf16.msra.mxu1 %v2888_v4  ;;  %1340 = vmatprep.subr.bf16.mxu0 %v2893_v5 }
 0x109   : > { %1381 = vmatprep.subr.bf16.mxu1 %v2896_v8 }
 0x10b   : > { %1341 = vmatpush2.bf16.msra.mxu0 %v2891_v9 }
 0x10c   : > { %1382 = vmatpush2.bf16.msra.mxu1 %v2894_v10  ;;  %1342 = vmatprep.subr.bf16.mxu0 %v2899_v11 }
 0x10d   : > { %1383 = vmatprep.subr.bf16.mxu1 %v2902_v12 }
 0x10f   : > { %1343 = vmatpush2.bf16.msra.mxu0 %v2897_v13 }
 0x110   : > { %1384 = vmatpush2.bf16.msra.mxu1 %v2900_v14  ;;  %1344 = vmatprep.subr.bf16.mxu0 %v2905_v15 }
 0x111   : > { %1385 = vmatprep.subr.bf16.mxu1 %v2908_v16 }
 0x113   : > { %1345 = vmatpush2.bf16.msra.mxu0 %v2903_v19 }
 0x114   : > { %1386 = vmatpush2.bf16.msra.mxu1 %v2906_v20  ;;  %1346 = vmatprep.subr.bf16.mxu0 %v2911_v21 }
 0x115   : > { %1387 = vmatprep.subr.bf16.mxu1 %v2914_v22 }
 0x117   : > { %1347 = vmatpush2.bf16.msra.mxu0 %v2909_v23 }
 0x118   : > { %1388 = vmatpush2.bf16.msra.mxu1 %v2912_v24 }
 0x11a   : > { %1349 = vmatmul.mubr.bf16.vlgmr.msra.gmra.mxu0 %v3598_v17 }
 0x11b   : > { %1390 = vmatmul.mubr.bf16.vlgmr.msra.gmra.mxu1 %v3600_v18  ;;  %v1409_v18 = vsub.s32 %v1406_v39, %v3556_v42 }
 0x19a   : > { %v1268_v25 = vpop.f32.mrf.mxu0 }
 0x19b   : > { %v1309_v26 = vpop.f32.mrf.mxu1 }
 0x19c   : > { %v1310_v27 = vadd.f32 %v1309_v26, %v1268_v25  ;;  %v1270_v28 = vpop.f32.mrf.mxu0 }
 0x19d   : > { %v1311_v29 = vpop.f32.mrf.mxu1 }
 0x19e   : > { %v1312_v30 = vadd.f32 %v1311_v29, %v1270_v28  ;;  %v1272_v31 = vpop.f32.mrf.mxu0 }
 0x19f   : > { %v1313_v32 = vpop.f32.mrf.mxu1 }
 0x1a0   : > { %v1402_v33 = vcombine.low %v1310_v27, %v1312_v30  ;;  %v1273_v34 = vpop.f32.mrf.mxu0 }
 0x1a1   : > { %v1314_v35 = vpop.f32.mrf.mxu1 }
 0x1a2   : > { %v1410_v53 = vrot.slane %v1402_v33, %v1409_v18 }
 0x1da   : > { %v1350_v40 = vpop.f32.mrf.mxu0 }
 0x1db   : > { %v1391_v41 = vpop.f32.mrf.mxu1 }
 0x1dc   : > { %v1352_v43 = vpop.f32.mrf.mxu0  ;;  %v1392_v44 = vadd.f32 %v1391_v41, %v1350_v40 }
 0x1dd   : > { %v1393_v17 = vpop.f32.mrf.mxu1 }
 0x1de   : > { %v1394_v45 = vadd.f32 %v1393_v17, %v1352_v43  ;;  %v1354_v46 = vpop.f32.mrf.mxu0 }
 0x1df   : > { %v1395_v47 = vpop.f32.mrf.mxu1 }
 0x1e0   : > { %v1403_v50 = vcombine.low %v1392_v44, %v1394_v45  ;;  %v1355_v51 = vpop.f32.mrf.mxu0 }
 0x1e1   : > { %v1396_v52 = vpop.f32.mrf.mxu1 }
 0x1e2   : > { %v1417_v54 = vrot.slane %v1403_v50, %v1409_v18 }
 0x1e4   : > { %v1418_v55 = vcombine.low %v1410_v53, %v1417_v54 }
 0x1e6   : > { %v1425_v57 = vrot.slane %v1418_v55, %v1409_v18  ;;  %1436 = sbr.rel (%p2455_p8) target bundleno = 985 (0x3d9), region = 84 }
 0x1e8   : > { %v1427_v58 = vadd.f32 %v1425_v57, %v439_v56 }
 0x1ea   : > { %1432 = vst.msk [vmem:[#allocation2] sm:$0xf] %vm1430_vm1, %v1427_v58 }
 0x1eb   : > { %v2915_v59 = vld [vmem:[%s3918_s3 + $0x78] sm:$0xff]   ;;  %v2919_v62 = vld [vmem:[%s3918_s3 + $0x70] sm:$0xff]   ;;  %v2923_v2 = vld [vmem:[%s3918_s3 + $0x68] sm:$0xff]   ;;  %vm2145_vm2 = vcmask 253952   ;;  %vm2163_vm3 = vcmask 0  }
 0x1ec   : > { %v2916_v60 = vld [vmem:[%s3918_s3 + $0xf8] sm:$0xff]   ;;  %2530 = vmatprep.subr.bf16.mxu0 %v2915_v59  ;;  %v2920_v63 = vld [vmem:[%s3918_s3 + $0xf0] sm:$0xff]   ;;  %v2924_v3 = vld [vmem:[%s3918_s3 + $0xe8] sm:$0xff]  }
 0x1ed   : > { %v2917_v61 = vld [vmem:[%s3918_s3 + $0x38] sm:$0xff]   ;;  %2552 = vmatprep.subr.bf16.mxu1 %v2916_v60  ;;  %v2921_v0 = vld [vmem:[%s3918_s3 + $0x30] sm:$0xff]   ;;  %v2925_v4 = vld [vmem:[%s3918_s3 + $0x28] sm:$0xff]  }
 0x1ee   : > { %v2918_v38 = vld [vmem:[%s3918_s3 + $0xb8] sm:$0xff]   ;;  %2531 = vmatpush3.bf16.msra.mxu0 %v2917_v61  ;;  %v2922_v1 = vld [vmem:[%s3918_s3 + $0xb0] sm:$0xff]   ;;  %v2926_v5 = vld [vmem:[%s3918_s3 + $0xa8] sm:$0xff]  }
 0x1ef   : > { %2553 = vmatpush3.bf16.msra.mxu1 %v2918_v38  ;;  %2532 = vmatprep.subr.bf16.mxu0 %v2919_v62  ;;  %v2927_v8 = vld [vmem:[%s3918_s3 + $0x60] sm:$0xff]   ;;  %v2931_v12 = vld [vmem:[%s3918_s3 + $0x58] sm:$0xff]   ;;  %v2935_v16 = vld [vmem:[%s3918_s3 + $0x50] sm:$0xff]  }
 0x1f0   : > { %2554 = vmatprep.subr.bf16.mxu1 %v2920_v63  ;;  %v2928_v9 = vld [vmem:[%s3918_s3 + $0xe0] sm:$0xff]   ;;  %v2932_v13 = vld [vmem:[%s3918_s3 + $0xd8] sm:$0xff]   ;;  %v2936_v19 = vld [vmem:[%s3918_s3 + $0xd0] sm:$0xff]  }
 0x1f1   : > { %v2929_v10 = vld [vmem:[%s3918_s3 + $0x20] sm:$0xff]   ;;  %v2933_v14 = vld [vmem:[%s3918_s3 + $0x18] sm:$0xff]   ;;  %v2937_v20 = vld [vmem:[%s3918_s3 + $0x10] sm:$0xff]  }
 0x1f2   : > { %2533 = vmatpush3.bf16.msra.mxu0 %v2921_v0  ;;  %v2930_v11 = vld [vmem:[%s3918_s3 + $0xa0] sm:$0xff]   ;;  %v2934_v15 = vld [vmem:[%s3918_s3 + $0x98] sm:$0xff]   ;;  %v2938_v21 = vld [vmem:[%s3918_s3 + $0x90] sm:$0xff]  }
 0x1f3   : > { %2555 = vmatpush3.bf16.msra.mxu1 %v2922_v1  ;;  %2534 = vmatprep.subr.bf16.mxu0 %v2923_v2  ;;  %v2939_v22 = vld [vmem:[%s3918_s3 + $0x48] sm:$0xff]   ;;  %v2943_v26 = vld [vmem:[%s3918_s3 + $0x40] sm:$0xff]   ;;  %v2947_v33 = vld [vmem:[%s3920_s5 + $0x78] sm:$0xff]  }
 0x1f4   : > { %2556 = vmatprep.subr.bf16.mxu1 %v2924_v3  ;;  %v2940_v23 = vld [vmem:[%s3918_s3 + $0xc8] sm:$0xff]   ;;  %v2944_v27 = vld [vmem:[%s3918_s3 + $0xc0] sm:$0xff]   ;;  %v2948_v34 = vld [vmem:[%s3920_s5 + $0xf8] sm:$0xff]  }
 0x1f5   : > { %v2941_v24 = vld [vmem:[%s3918_s3 + $0x8] sm:$0xff]   ;;  %v2945_v28 = vld [vmem:[%s3918_s3] sm:$0xff]   ;;  %v2949_v41 = vld [vmem:[%s3920_s5 + $0x38] sm:$0xff]  }
 0x1f6   : > { %2535 = vmatpush3.bf16.msra.mxu0 %v2925_v4  ;;  %v2942_v25 = vld [vmem:[%s3918_s3 + $0x88] sm:$0xff]   ;;  %v2946_v29 = vld [vmem:[%s3918_s3 + $0x80] sm:$0xff]   ;;  %v2950_v43 = vld [vmem:[%s3920_s5 + $0xb8] sm:$0xff]  }
 0x1f7   : > { %2557 = vmatpush3.bf16.msra.mxu1 %v2926_v5  ;;  %2536 = vmatprep.subr.bf16.mxu0 %v2927_v8  ;;  %v1437_v30 = vld [vmem:[#allocation2] sm:$0xf]  ;;  %v1438_v31 = vld [vmem:[#allocation8] sm:$0xf]  ;;  %v2952_v42 = vld [vmem:[%s3920_s5 + $0xf0] sm:$0xff]  }
 0x1f8   : > { %2558 = vmatprep.subr.bf16.mxu1 %v2928_v9  ;;  %v1439_v32 = vadd.f32 %v1438_v31, %v1437_v30  ;;  %v2955_v45 = vld [vmem:[%s3920_s5 + $0x68] sm:$0xff]   ;;  %v2959_v51 = vld [vmem:[%s3920_s5 + $0x60] sm:$0xff]   ;;  %v2963_v55 = vld [vmem:[%s3920_s5 + $0x58] sm:$0xff]  }
 0x1f9   : > { %v2956_v46 = vld [vmem:[%s3920_s5 + $0xe8] sm:$0xff]   ;;  %v2960_v52 = vld [vmem:[%s3920_s5 + $0xe0] sm:$0xff]   ;;  %v2964_v56 = vld [vmem:[%s3920_s5 + $0xd8] sm:$0xff]  }
 0x1fa   : > { %2537 = vmatpush3.bf16.msra.mxu0 %v2929_v10  ;;  %v1440_v35 = vmax.f32 %v1439_v32, 0.0  ;;  %v2957_v47 = vld [vmem:[%s3920_s5 + $0x28] sm:$0xff]   ;;  %v2961_v53 = vld [vmem:[%s3920_s5 + $0x20] sm:$0xff]   ;;  %v2965_v57 = vld [vmem:[%s3920_s5 + $0x18] sm:$0xff]  }
 0x1fb   : > { %2559 = vmatpush3.bf16.msra.mxu1 %v2930_v11  ;;  %2538 = vmatprep.subr.bf16.mxu0 %v2931_v12  ;;  %v2958_v50 = vld [vmem:[%s3920_s5 + $0xa8] sm:$0xff]   ;;  %v2962_v54 = vld [vmem:[%s3920_s5 + $0xa0] sm:$0xff]   ;;  %v2966_v58 = vld [vmem:[%s3920_s5 + $0x98] sm:$0xff]  }
 0x1fc   : > { %2560 = vmatprep.subr.bf16.mxu1 %v2932_v13  ;;  %v1449_v36 = vrot.slane %v1440_v35, %v448_v48  ;;  %v1457_v37 = vrot.slane %v1440_v35, %v456_v49  ;;  %v1445_v39 = vrot.slane %v1440_v35, %v444_v6  ;;  %v1453_v40 = vrot.slane %v1440_v35, %v452_v7  ;;  %v2951_v49 = vld [vmem:[%s3920_s5 + $0x70] sm:$0xff]   ;;  %v2971_v62 = vld [vmem:[%s3920_s5 + $0x48] sm:$0xff]   ;;  %v2975_v2 = vld [vmem:[%s3920_s5 + $0x40] sm:$0xff]  }
 0x1fd   : > { %v2953_v6 = vld [vmem:[%s3920_s5 + $0x30] sm:$0xff]   ;;  %v2972_v63 = vld [vmem:[%s3920_s5 + $0xc8] sm:$0xff]   ;;  %v2976_v3 = vld [vmem:[%s3920_s5 + $0xc0] sm:$0xff]  }
 0x1fe   : > { %2539 = vmatpush3.bf16.msra.mxu0 %v2933_v14  ;;  %v1463_v17 = vpack.c.bf16 %v1449_v36, %v1449_v36  ;;  %v1465_v18 = vpack.c.bf16 %v1457_v37, %v1457_v37  ;;  %v3787_v48 = vpack.c.bf16 %v1445_v39, %v1445_v39  ;;  %v3789_v44 = vpack.c.bf16 %v1453_v40, %v1453_v40  ;;  %v2954_v7 = vld [vmem:[%s3920_s5 + $0xb0] sm:$0xff]   ;;  %v2973_v0 = vld [vmem:[%s3920_s5 + $0x8] sm:$0xff]   ;;  %v2977_v4 = vld [vmem:[%s3920_s5] sm:$0xff]  }
 0x1ff   : > { %2561 = vmatpush3.bf16.msra.mxu1 %v2934_v15  ;;  %2540 = vmatprep.subr.bf16.mxu0 %v2935_v16  ;;  %v2967_v59 = vld [vmem:[%s3920_s5 + $0x50] sm:$0xff]   ;;  %v2974_v1 = vld [vmem:[%s3920_s5 + $0x88] sm:$0xff]   ;;  %v2978_v5 = vld [vmem:[%s3920_s5 + $0x80] sm:$0xff]  }
 0x200   : > { %2562 = vmatprep.subr.bf16.mxu1 %v2936_v19  ;;  %1755 = vmatprep.mubr.bf16.mxu0 %v1463_v17  ;;  %v2968_v60 = vld [vmem:[%s3920_s5 + $0xd0] sm:$0xff]  }
 0x201   : > { %1795 = vmatprep.mubr.bf16.mxu1 %v1465_v18  ;;  %v2969_v61 = vld [vmem:[%s3920_s5 + $0x10] sm:$0xff]  }
 0x202   : > { %2541 = vmatpush3.bf16.msra.mxu0 %v2937_v20  ;;  %v2970_v38 = vld [vmem:[%s3920_s5 + $0x90] sm:$0xff]  }
 0x203   : > { %2563 = vmatpush3.bf16.msra.mxu1 %v2938_v21  ;;  %2542 = vmatprep.subr.bf16.mxu0 %v2939_v22  ;;  %v1867_v20 = vld [vmem:[#allocation11] sm:$0x1]  ;;  %v2142_v37 = vld [vmem:[#allocation12] sm:$0x1] }
 0x204   : > { %2564 = vmatprep.subr.bf16.mxu1 %v2940_v23 }
 0x206   : > { %2543 = vmatpush3.bf16.msra.mxu0 %v2941_v24 }
 0x207   : > { %2565 = vmatpush3.bf16.msra.mxu1 %v2942_v25  ;;  %2544 = vmatprep.subr.bf16.mxu0 %v2943_v26 }
 0x208   : > { %2566 = vmatprep.subr.bf16.mxu1 %v2944_v27 }
 0x20a   : > { %2545 = vmatpush3.bf16.msra.mxu0 %v2945_v28 }
 0x20b   : > { %2567 = vmatpush3.bf16.msra.mxu1 %v2946_v29  ;;  %2574 = vmatprep.subr.bf16.mxu0 %v2947_v33  ;;  %v1530_v33 = vld [vmem:[#allocation9] sm:$0x1] }
 0x20c   : > { %2596 = vmatprep.subr.bf16.mxu1 %v2948_v34 }
 0x20d   : > { %1756 = vmatmul.mubr.bf16.vlgmr.msra.gmra.mxu0 %v3787_v48 }
 0x20e   : > { %1796 = vmatmul.mubr.bf16.vlgmr.msra.gmra.mxu1 %v3789_v44  ;;  %2575 = vmatpush3.bf16.msra.mxu0 %v2949_v41 }
 0x20f   : > { %2597 = vmatpush3.bf16.msra.mxu1 %v2950_v43  ;;  %2576 = vmatprep.subr.bf16.mxu0 %v2951_v49 }
 0x210   : > { %2598 = vmatprep.subr.bf16.mxu1 %v2952_v42  ;;  %2092 = vmatprep.mubr.bf16.mxu0 %v1463_v17 }
 0x211   : > { %2132 = vmatprep.mubr.bf16.mxu1 %v1465_v18 }
 0x212   : > { %2577 = vmatpush3.bf16.msra.mxu0 %v2953_v6 }
 0x213   : > { %2599 = vmatpush3.bf16.msra.mxu1 %v2954_v7  ;;  %2578 = vmatprep.subr.bf16.mxu0 %v2955_v45 }
 0x214   : > { %2600 = vmatprep.subr.bf16.mxu1 %v2956_v46 }
 0x216   : > { %2579 = vmatpush3.bf16.msra.mxu0 %v2957_v47 }
 0x217   : > { %2601 = vmatpush3.bf16.msra.mxu1 %v2958_v50  ;;  %2580 = vmatprep.subr.bf16.mxu0 %v2959_v51 }
 0x218   : > { %2602 = vmatprep.subr.bf16.mxu1 %v2960_v52 }
 0x21a   : > { %2581 = vmatpush3.bf16.msra.mxu0 %v2961_v53 }
 0x21b   : > { %2603 = vmatpush3.bf16.msra.mxu1 %v2962_v54  ;;  %2582 = vmatprep.subr.bf16.mxu0 %v2963_v55 }
 0x21c   : > { %2604 = vmatprep.subr.bf16.mxu1 %v2964_v56 }
 0x21e   : > { %2583 = vmatpush3.bf16.msra.mxu0 %v2965_v57 }
 0x21f   : > { %2605 = vmatpush3.bf16.msra.mxu1 %v2966_v58  ;;  %2584 = vmatprep.subr.bf16.mxu0 %v2967_v59 }
 0x220   : > { %2606 = vmatprep.subr.bf16.mxu1 %v2968_v60 }
 0x222   : > { %2585 = vmatpush3.bf16.msra.mxu0 %v2969_v61 }
 0x223   : > { %2607 = vmatpush3.bf16.msra.mxu1 %v2970_v38  ;;  %2586 = vmatprep.subr.bf16.mxu0 %v2971_v62 }
 0x224   : > { %2608 = vmatprep.subr.bf16.mxu1 %v2972_v63 }
 0x226   : > { %2587 = vmatpush3.bf16.msra.mxu0 %v2973_v0 }
 0x227   : > { %2609 = vmatpush3.bf16.msra.mxu1 %v2974_v1  ;;  %2588 = vmatprep.subr.bf16.mxu0 %v2975_v2 }
 0x228   : > { %2610 = vmatprep.subr.bf16.mxu1 %v2976_v3 }
 0x22a   : > { %2589 = vmatpush3.bf16.msra.mxu0 %v2977_v4 }
 0x22b   : > { %2611 = vmatpush3.bf16.msra.mxu1 %v2978_v5 }
 0x22d   : > { %2093 = vmatmul.mubr.bf16.vlgmr.msra.gmra.mxu0 %v3787_v48 }
 0x22e   : > { %2133 = vmatmul.mubr.bf16.vlgmr.msra.gmra.mxu1 %v3789_v44 }
 0x2cd   : > { %v2546_v8 = vpop.f32.mrf.mxu0 }
 0x2ce   : > { %v2568_v9 = vpop.f32.mrf.mxu1 }
 0x2cf   : > { %v2547_v10 = vpop.f32.mrf.mxu0 }
 0x2d0   : > { %v2569_v11 = vpop.f32.mrf.mxu1  ;;  %v2548_v32 = vadd.f32 %v2547_v10, %v2546_v8 }
 0x2d1   : > { %v2549_v12 = vpop.f32.mrf.mxu0  ;;  %v2570_v35 = vadd.f32 %v2569_v11, %v2568_v9 }
 0x2d2   : > { %v2571_v13 = vpop.f32.mrf.mxu1  ;;  %v1758_v34 = vadd.f32 %v2548_v32, %v1530_v33 }
 0x2d3   : > { %v2550_v14 = vpop.f32.mrf.mxu0 }
 0x2d4   : > { %v2572_v15 = vpop.f32.mrf.mxu1  ;;  %v1798_v36 = vadd.f32 %v2570_v35, %v1758_v34 }
 0x2d6   : > { %v2148_v40 = vmul.f32 %v1798_v36, %v1798_v36 }
 0x2ed   : > { %v2590_v16 = vpop.f32.mrf.mxu0 }
 0x2ee   : > { %v2612_v19 = vpop.f32.mrf.mxu1 }
 0x2ef   : > { %v2591_v21 = vpop.f32.mrf.mxu0 }
 0x2f0   : > { %v2613_v22 = vpop.f32.mrf.mxu1  ;;  %v2592_v23 = vadd.f32 %v2591_v21, %v2590_v16 }
 0x2f1   : > { %v2593_v24 = vpop.f32.mrf.mxu0  ;;  %v2614_v27 = vadd.f32 %v2613_v22, %v2612_v19 }
 0x2f2   : > { %v2615_v25 = vpop.f32.mrf.mxu1  ;;  %v2095_v26 = vadd.f32 %v2592_v23, %v1867_v20 }
 0x2f3   : > { %v2594_v28 = vpop.f32.mrf.mxu0 }
 0x2f4   : > { %v2616_v29 = vpop.f32.mrf.mxu1  ;;  %v2135_v30 = vadd.f32 %v2614_v27, %v2095_v26 }
 0x2f6   : > { %v2140_v31 = vmul.f32 1.442695, %v2135_v30 }
 0x2f8   : > { %2979 = vpow2.f32 %v2140_v31 }
 0x305   : > { %v2980_v39 = vpop.eup %2979 }
 0x306   : > { %v2143_v41 = vmul.f32 %v2980_v39, %v2142_v37  ;;  %v2147_v43 = vmul.f32 %v2980_v39, %v2980_v39 }
 0x308   : > { %v2144_v17 = vadd.f32 %v2143_v41, %v1798_v36  ;;  %v2149_v18 = vadd.f32 %v2148_v40, %v2147_v43 }
 0x30a   : > { %2146 = vst.msk [vmem:[#allocation14] sm:$0x1] %vm2145_vm2, %v2144_v17  ;;  %v2150_v48 = vsub.f32 %v2149_v18, %v2135_v30 }
 0x30c   : > { %v2520_v44 = vadd.f32 -0.5, %v2150_v48 }
 0x30e   : > { %v2152_v49 = vsel %vm2145_vm2, %v2520_v44, 0.0 }
 0x30f   : > { %2153 = vadd.xlane.f32.xlu0 %v2152_v49 }
 0x398   : > { %v2154_v42 = vpop.xlane.xlu0 %2153 }
 0x399   : > { %v2155_v6 = vrot.slane %v2154_v42, 4 }
 0x39b   : > { %v2156_v7 = vadd.f32 %v2155_v6, %v2154_v42 }
 0x39d   : > { %v2157_v45 = vrot.slane %v2156_v7, 2 }
 0x39f   : > { %v2158_v46 = vadd.f32 %v2157_v45, %v2156_v7 }
 0x3a1   : > { %v2159_v47 = vrot.slane %v2158_v46, 1 }
 0x3a3   : > { %v2160_v50 = vadd.f32 %v2159_v47, %v2158_v46 }
 0x3a5   : > { %2618 = vpush %v2160_v50 }
 0x3d6   : > { %s2619_s30 = spop %2618 }
 0x3d7   : > { %v2162_v51 = vstv %s2619_s30 }
 0x3d8   : > { %2164 = vst.msk [vmem:[#allocation15] sm:$0x1] %vm2163_vm3, %v2162_v51 }
 0x3d9 PF: > { %p2677_p11 = scmp.eq.s32.totalorder %s3332_s15, 3  ;;  %s3259_s18 = smov [#allocation14]  }
 0x3da   : > { %s2172_s12 = sshll.u32 %s3259_s18, 4  ;;  %s3260_s25 = smov [#allocation15]   ;;  %s2173_s12 = int_to_ptr.vmem [resolvable:$true] %s2172_s12 }
 0x3db   : > { %s2183_s26 = sshll.u32 %s3260_s25, 4  ;;  %s3141_s24 = scalar_lea.vmem %s2173_s12, 16  ;;  %s2184_s26 = int_to_ptr.vmem [resolvable:$true] %s2183_s26 }
 0x3dc   : > { %p3142_p12 = scmp.ne.s32.totalorder %s2173_s12, %s3141_s24  ;;  %s3147_s23 = scalar_lea.vmem %s2173_s12, 32 }
 0x3dd   : > { %p3148_p10 = scmp.lt.s32.totalorder %s2173_s12, %s2173_s12  ;;  %p3149_p13 = scmp.lt.s32.totalorder %s3147_s23, %s3141_s24 }
 0x3de   : > { %p3143_p4 = pnand %p3142_p12, %p2677_p11 }
 0x3df   : > { %p3150_p6 = por %p3149_p13, %p3148_p10 }
 0x3e0   : > { %p3144_p9 = pneg %p3143_p4 }
 0x3e2   : > { %p3151_p7 = pnand %p3150_p6, %p3144_p9 }
 0x3e4   : > { %3154 = shalt.err (!%p3151_p7)
}
 0x3e5   : > { %2641 = dma.vmem_to_hbm [thread:$0]  (%p2677_p11), %s2173_s12, 16, %s3923_s8, [#allocation5]  }
 0x3e6   : > { %s3165_s29 = scalar_lea.vmem %s2184_s26, 16  ;;  %s3171_s13 = scalar_lea.vmem %s2184_s26, 32 }
 0x3e7   : > { %p3166_p1 = scmp.ne.s32.totalorder %s2184_s26, %s3165_s29  ;;  %p3172_p2 = scmp.lt.s32.totalorder %s2184_s26, %s2184_s26 }
 0x3e8   : > { %p3173_p5 = scmp.lt.s32.totalorder %s3171_s13, %s3165_s29 }
 0x3e9   : > { %p3167_p3 = pnand %p3166_p1, %p2677_p11 }
 0x3ea   : > { %p3174_p8 = por %p3173_p5, %p3172_p2 }
 0x3eb   : > { %p3168_p0 = pneg %p3167_p3 }
 0x3ed   : > { %p3175_p12 = pnand %p3174_p8, %p3168_p0 }
 0x3ef   : > { %3178 = shalt.err (!%p3175_p12)
}
 0x3f0   : > { %2643 = dma.vmem_to_hbm [thread:$0]  (%p2677_p11), %s2184_s26, 16, %s3924_s9, [#allocation16]  }
 0x3f1   : > { %3226 = dma.done.wait (%p2677_p11), [#allocation5], 16  }
 0x3f2   : > { %3228 = vsyncadd (%p2677_p11), [#allocation5], 4294967280 }
 0x3f3   : > { %3230 = dma.done.wait (%p2677_p11), [#allocation16], 16  }
 0x3f4   : > { %3232 = vsyncadd (%p2677_p11), [#allocation16], 4294967280 }
 0x3f5 PF: > { %p27_p4 = scmp.ge.s32.totalorder %s3396_s20, 6   ;;  %s3944_s30 = smov %s3239_s10 }
 0x3f6   : > { %s3945_s10 = smov %s3243_s11  ;;  %s3946_s11 = smov %s3408_s28 }
 0x3f7   : > { %s3947_s12 = smov %s3396_s20  ;;  %29 = sbr.rel (!%p27_p4) target bundleno = 11 (0xb), region = 134 }
 0x3fc   :  { %2200 = vsyncpa [#allocation4], 1 }
 0x3fd   :  { %2202 = vsyncpa [#allocation4 + $0x1], 1 }
 0x3fe   :  { %2203 = vsyncpa [#allocation7], 1 }
 0x3ff   :  { %2205 = vsyncpa [#allocation7 + $0x1], 1 }
 0x400   :  { %2206 = vsyncpa [#allocation10], 1 }
 0x401   :  { %2207 = vsyncpa [#allocation13], 1 }
 0x402   :  { %2208 = vsyncpa [#allocation5], 1 }
 0x403   :  { %2210 = vsyncpa [#allocation5 + $0x1], 1 }
 0x404   :  { %2211 = vsyncpa [#allocation16], 1 }

</bundles_post_ra>
